<compile_context>
chip_gen: v7x
topology: tpu7x:2x2x1
jax: 0.10.0
libtpu: 0.0.40
codegen_flags: <defaults>
</compile_context>

<pallas_src>
import functools

import jax
import jax.numpy as jnp
from jax import lax
from jax.experimental import pallas as pl
from jax.experimental.pallas import tpu as pltpu


_VMEM = pl.BlockSpec(memory_space=pltpu.MemorySpace.VMEM)
_SMEM = pl.BlockSpec(memory_space=pltpu.MemorySpace.SMEM)


# ----------------------------------------------------------------------------
# Shared in-kernel body: fused bidirectional LSTM recurrence + max-pool over time
# ----------------------------------------------------------------------------
def _bilstm_maxpool(x_ref, wih_ref, whh_ref, b_ref):
    """x_ref: (T, BBp, H) f32. Returns (BBp, 2H) f32 = [max_t h_fwd | max_t h_bwd]."""
    T, BB, H = x_ref.shape
    G = 4 * H                       # per-direction gate width (i,f,g,o)

    wih = wih_ref[...]              # (H, 8H)  bf16   [fwd gates | bwd gates]
    whh = whh_ref[...]              # (2H, 8H) bf16   block-diag(whh_f, whh_b)
    b = b_ref[...]                  # (1, 8H)  f32    combined b_ih + b_hh, both dirs

    # --- Hoisted input projection: one big matmul, bias folded in (off the serial chain).
    x_flat = x_ref[...].reshape(T * BB, H).astype(jnp.bfloat16)        # tile-aligned (BBp % 8 == 0)
    xz = jnp.dot(x_flat, wih, preferred_element_type=jnp.float32) + b  # (T*BB, 8H) f32
    xz = xz.reshape(T, BB, 2 * G)

    def gate_math(gates, c):
        # PyTorch gate order: i, f, g, o.  (H=32 lane sub-slices of one vreg; cheap VPU selects.)
        i = jax.nn.sigmoid(gates[:, 0 * H:1 * H])
        f = jax.nn.sigmoid(gates[:, 1 * H:2 * H])
        g = jnp.tanh(gates[:, 2 * H:3 * H])
        o = jax.nn.sigmoid(gates[:, 3 * H:4 * H])
        c_new = f * c + i * g
        h_new = o * jnp.tanh(c_new)
        return h_new, c_new

    c_f = jnp.zeros((BB, H), jnp.float32)
    c_b = jnp.zeros((BB, H), jnp.float32)
    h_cat = None
    m_f = m_b = None

    # Static unroll: T is a compile-time constant; reverse index tb is static too.
    for t in range(T):
        tb = T - 1 - t
        if t == 0:
            rec_f = rec_b = 0.0                                   # h0 = 0 -> skip first matmul
        else:
            rec = jnp.dot(h_cat.astype(jnp.bfloat16), whh,
                          preferred_element_type=jnp.float32)     # (BB, 8H): one MXU push/step
            rec_f, rec_b = rec[:, :G], rec[:, G:]                 # vreg-aligned splits
        gates_f = xz[t, :, :G] + rec_f
        gates_b = xz[tb, :, G:] + rec_b
        h_f, c_f = gate_math(gates_f, c_f)
        h_b, c_b = gate_math(gates_b, c_b)
        m_f = h_f if t == 0 else jnp.maximum(m_f, h_f)            # running max-pool over time
        m_b = h_b if t == 0 else jnp.maximum(m_b, h_b)
        h_cat = jnp.concatenate([h_f, h_b], axis=-1)              # (BB, 2H) state for next step

    return jnp.concatenate([m_f, m_b], axis=-1)                   # (BB, 2H)


# ----------------------------------------------------------------------------
# Kernel 1: encoder only (single-sentence path)
# ----------------------------------------------------------------------------
def _encode_kernel(x_ref, wih_ref, whh_ref, b_ref, o_ref):
    out = _bilstm_maxpool(x_ref, wih_ref, whh_ref, b_ref)
    o_ref[...] = out.astype(o_ref.dtype)                          # single lane-dense store


# ----------------------------------------------------------------------------
# Kernel 2: batched a/p/n encoder + fused cosine triplet loss (one launch)
# ----------------------------------------------------------------------------
def _triplet_kernel(x_ref, wih_ref, whh_ref, b_ref, loss_ref, *, batch, margin):
    emb = _bilstm_maxpool(x_ref, wih_ref, whh_ref, b_ref)         # (BBp, 2H); rows >= 3*batch are pad
    a = emb[0 * batch:1 * batch]
    p = emb[1 * batch:2 * batch]
    n = emb[2 * batch:3 * batch]

    def normalize(v):
        # torch F.normalize: v / max(||v||, 1e-12); rsqrt goes to the EUP slot.
        ss = jnp.sum(v * v, axis=-1, keepdims=True)
        return v * lax.rsqrt(jnp.maximum(ss, 1e-24))

    a = normalize(a)
    p = normalize(p)
    n = normalize(n)
    ap = 1.0 - jnp.sum(a * p, axis=-1, keepdims=True)             # (batch, 1)
    an = 1.0 - jnp.sum(a * n, axis=-1, keepdims=True)
    diff = ap - an + margin
    mask = (diff > 0.0).astype(jnp.float32)
    loss_ref[0, 0] = jnp.sum(diff * mask) / jnp.sum(mask)         # NaN if no positives (== torch)


# ----------------------------------------------------------------------------
# Jitted wrappers (embedding gather / padding / transpose are XLA glue inside one dispatch)
# ----------------------------------------------------------------------------
def _round_up8(n):
    return ((n + 7) // 8) * 8


def _embed(embedding, ids, pad_to):
    b, _ = ids.shape
    ids_p = jnp.pad(ids, ((0, pad_to - b), (0, 0)))               # pad rows use token 0 (zero row)
    x = jnp.take(embedding, ids_p, axis=0)                        # (pad_to, T, H)
    return jnp.transpose(x, (1, 0, 2))                            # (T, pad_to, H) time-major f32


@jax.jit
def _encode_fn(params, ids):
    H = params["wih"].shape[0]
    B = ids.shape[0]
    BBp = _round_up8(B)
    x = _embed(params["embedding"], ids, BBp)
    out = pl.pallas_call(
        _encode_kernel,
        out_shape=jax.ShapeDtypeStruct((BBp, 2 * H), jnp.float32),
        in_specs=[_VMEM] * 4,
        out_specs=_VMEM,
    )(x, params["wih"], params["whh"], params["b"])
    return out[:B]


@jax.jit
def _triplet_fn(params, s1, s2, s3):
    H = params["wih"].shape[0]
    B = s1.shape[0]
    ids = jnp.concatenate([s1, s2, s3], axis=0)                   # (3B, T) -> one encode launch
    BBp = _round_up8(3 * B)
    x = _embed(params["embedding"], ids, BBp)
    loss = pl.pallas_call(
        functools.partial(_triplet_kernel, batch=B, margin=0.1),
        out_shape=jax.ShapeDtypeStruct((1, 1), jnp.float32),
        in_specs=[_VMEM] * 4,
        out_specs=_SMEM,
    )(x, params["wih"], params["whh"], params["b"])
    return loss[0, 0]


# ----------------------------------------------------------------------------
# Model wrapper (parameter setup in plain JAX)
# ----------------------------------------------------------------------------
class SiameseNetworkPallas:
    def __init__(self, config, key):
        H = config["hidden_size"]
        V = config["vocab_size"] + 1
        k = 1.0 / jnp.sqrt(jnp.float32(H))
        keys = jax.random.split(key, 11)

        def u(kk, shape):
            return jax.random.uniform(kk, shape, jnp.float32, -k, k)

        emb = u(keys[0], (V, H))
        emb = emb.at[0].set(0.0)                                   # padding_idx=0

        # Per-direction weights, PyTorch gate order (i,f,g,o), stored pre-transposed (H, 4H).
        wih_f = u(keys[1], (H, 4 * H))
        wih_b = u(keys[2], (H, 4 * H))
        whh_f = u(keys[3], (H, 4 * H))
        whh_b = u(keys[4], (H, 4 * H))
        b_f = u(keys[5], (1, 4 * H)) + u(keys[6], (1, 4 * H))      # b_ih + b_hh
        b_b = u(keys[7], (1, 4 * H)) + u(keys[8], (1, 4 * H))

        # Fused layouts: input proj (H, 8H) = [fwd | bwd]; recurrent (2H, 8H) block-diagonal.
        wih = jnp.concatenate([wih_f, wih_b], axis=1)
        whh = jnp.zeros((2 * H, 8 * H), jnp.float32)
        whh = whh.at[:H, :4 * H].set(whh_f).at[H:, 4 * H:].set(whh_b)
        b = jnp.concatenate([b_f, b_b], axis=1)

        self.params = {
            "embedding": emb,                                      # f32 (V, H)
            "wih": wih.astype(jnp.bfloat16),                       # bf16 MXU inputs, f32 accum
            "whh": whh.astype(jnp.bfloat16),
            "b": b,                                                # f32 (1, 8H)
        }

    def encode(self, ids):
        return _encode_fn(self.params, ids)

    def __call__(self, s1, s2=None, s3=None):
        if s2 is not None and s3 is not None:
            return _triplet_fn(self.params, s1, s2, s3)
        return self.encode(s1)


# ----------------------------------------------------------------------------
# Main
# ----------------------------------------------------------------------------
if __name__ == "__main__":
    config = {"hidden_size": 32, "vocab_size": 15, "max_length": 8}
    B, T = 2, config["max_length"]
    V = config["vocab_size"] + 1

    key = jax.random.PRNGKey(0)
    k_model, k1, k2, k3 = jax.random.split(key, 4)

    model = SiameseNetworkPallas(config, k_model)

    def make_ids(kk):
        ids = jax.random.randint(kk, (B, T), 1, V, dtype=jnp.int32)
        return ids.at[:, 6:].set(0)  # trailing padding tokens (id 0)

    s1, s2, s3 = make_ids(k1), make_ids(k2), make_ids(k3)

    # Single-sentence encoding path
    emb = jax.block_until_ready(model(s1))
    assert emb.shape == (B, 2 * config["hidden_size"])

    # Triplet-loss path (single fused pallas_call)
    loss = jax.block_until_ready(model(s1, s2, s3))
    assert loss.shape == ()

    print("KERNEL_OK")
</pallas_src>

<mosaic_0001>
module attributes {stable_mosaic.version = 11 : i64} {
  func.func @_encode_kernel(%arg0: memref<8x8x32xf32, #tpu.memory_space<vmem>>, %arg1: memref<32x256xbf16, #tpu.memory_space<vmem>>, %arg2: memref<64x256xbf16, #tpu.memory_space<vmem>>, %arg3: memref<1x256xf32, #tpu.memory_space<vmem>>, %arg4: memref<8x64xf32, #tpu.memory_space<vmem>>) attributes {dimension_semantics = [], scalar_prefetch = 0 : i64, scratch_operands = 0 : i64, tpu.core_type = #tpu.core_type<tc>} {
    %c0 = arith.constant 0 : index
    %c0_0 = arith.constant 0 : index
    %0 = vector.load %arg1[%c0, %c0_0] : memref<32x256xbf16, #tpu.memory_space<vmem>>, vector<32x256xbf16>
    %c0_1 = arith.constant 0 : index
    %c0_2 = arith.constant 0 : index
    %1 = vector.load %arg2[%c0_1, %c0_2] : memref<64x256xbf16, #tpu.memory_space<vmem>>, vector<64x256xbf16>
    %c0_3 = arith.constant 0 : index
    %c0_4 = arith.constant 0 : index
    %2 = vector.load %arg3[%c0_3, %c0_4] : memref<1x256xf32, #tpu.memory_space<vmem>>, vector<1x256xf32>
    %c0_5 = arith.constant 0 : index
    %c0_6 = arith.constant 0 : index
    %c0_7 = arith.constant 0 : index
    %3 = vector.load %arg0[%c0_5, %c0_6, %c0_7] : memref<8x8x32xf32, #tpu.memory_space<vmem>>, vector<8x8x32xf32>
    %4 = vector.shape_cast %3 : vector<8x8x32xf32> to vector<64x32xf32>
    %5 = arith.truncf %4 : vector<64x32xf32> to vector<64x32xbf16>
    %cst = arith.constant dense<0.000000e+00> : vector<64x256xf32>
    %6 = tpu.matmul %5, %0, %cst {dimension_numbers = #tpu.dot_dimension_numbers<[1], [0], [0], [1], [0, 0, 1, 1], [], []>} : vector<64x32xbf16>, vector<32x256xbf16>, vector<64x256xf32> -> vector<64x256xf32>
    %7 = vector.broadcast %2 : vector<1x256xf32> to vector<64x256xf32>
    %8 = arith.addf %6, %7 : vector<64x256xf32>
    %9 = vector.shape_cast %8 : vector<64x256xf32> to vector<8x8x256xf32>
    %cst_8 = arith.constant 0.000000e+00 : f32
    %10 = vector.broadcast %cst_8 : f32 to vector<8x32xf32>
    %cst_9 = arith.constant 0.000000e+00 : f32
    %11 = vector.broadcast %cst_9 : f32 to vector<8x32xf32>
    %12 = vector.extract_strided_slice %9 {offsets = [0, 0, 0], sizes = [1, 8, 128], strides = [1, 1, 1]} : vector<8x8x256xf32> to vector<1x8x128xf32>
    %13 = vector.shape_cast %12 : vector<1x8x128xf32> to vector<8x128xf32>
    %cst_10 = arith.constant 0.000000e+00 : f32
    %14 = vector.broadcast %cst_10 : f32 to vector<8x128xf32>
    %15 = arith.addf %13, %14 : vector<8x128xf32>
    %16 = vector.extract_strided_slice %9 {offsets = [7, 0, 128], sizes = [1, 8, 128], strides = [1, 1, 1]} : vector<8x8x256xf32> to vector<1x8x128xf32>
    %17 = vector.shape_cast %16 : vector<1x8x128xf32> to vector<8x128xf32>
    %cst_11 = arith.constant 0.000000e+00 : f32
    %18 = vector.broadcast %cst_11 : f32 to vector<8x128xf32>
    %19 = arith.addf %17, %18 : vector<8x128xf32>
    %20 = vector.extract_strided_slice %15 {offsets = [0, 0], sizes = [8, 32], strides = [1, 1]} : vector<8x128xf32> to vector<8x32xf32>
    %21 = arith.negf %20 : vector<8x32xf32>
    %22 = math.exp %21 : vector<8x32xf32>
    %cst_12 = arith.constant 1.000000e+00 : f32
    %23 = vector.broadcast %cst_12 : f32 to vector<8x32xf32>
    %24 = arith.addf %23, %22 : vector<8x32xf32>
    %25 = arith.divf %23, %24 : vector<8x32xf32>
    %26 = vector.extract_strided_slice %15 {offsets = [0, 32], sizes = [8, 32], strides = [1, 1]} : vector<8x128xf32> to vector<8x32xf32>
    %27 = arith.negf %26 : vector<8x32xf32>
    %28 = math.exp %27 : vector<8x32xf32>
    %cst_13 = arith.constant 1.000000e+00 : f32
    %29 = vector.broadcast %cst_13 : f32 to vector<8x32xf32>
    %30 = arith.addf %29, %28 : vector<8x32xf32>
    %31 = arith.divf %29, %30 : vector<8x32xf32>
    %32 = vector.extract_strided_slice %15 {offsets = [0, 64], sizes = [8, 32], strides = [1, 1]} : vector<8x128xf32> to vector<8x32xf32>
    %33 = math.tanh %32 : vector<8x32xf32>
    %34 = vector.extract_strided_slice %15 {offsets = [0, 96], sizes = [8, 32], strides = [1, 1]} : vector<8x128xf32> to vector<8x32xf32>
    %35 = arith.negf %34 : vector<8x32xf32>
    %36 = math.exp %35 : vector<8x32xf32>
    %cst_14 = arith.constant 1.000000e+00 : f32
    %37 = vector.broadcast %cst_14 : f32 to vector<8x32xf32>
    %38 = arith.addf %37, %36 : vector<8x32xf32>
    %39 = arith.divf %37, %38 : vector<8x32xf32>
    %40 = arith.mulf %31, %10 : vector<8x32xf32>
    %41 = arith.mulf %25, %33 : vector<8x32xf32>
    %42 = arith.addf %40, %41 : vector<8x32xf32>
    %43 = math.tanh %42 : vector<8x32xf32>
    %44 = arith.mulf %39, %43 : vector<8x32xf32>
    %45 = vector.extract_strided_slice %19 {offsets = [0, 0], sizes = [8, 32], strides = [1, 1]} : vector<8x128xf32> to vector<8x32xf32>
    %46 = arith.negf %45 : vector<8x32xf32>
    %47 = math.exp %46 : vector<8x32xf32>
    %cst_15 = arith.constant 1.000000e+00 : f32
    %48 = vector.broadcast %cst_15 : f32 to vector<8x32xf32>
    %49 = arith.addf %48, %47 : vector<8x32xf32>
    %50 = arith.divf %48, %49 : vector<8x32xf32>
    %51 = vector.extract_strided_slice %19 {offsets = [0, 32], sizes = [8, 32], strides = [1, 1]} : vector<8x128xf32> to vector<8x32xf32>
    %52 = arith.negf %51 : vector<8x32xf32>
    %53 = math.exp %52 : vector<8x32xf32>
    %cst_16 = arith.constant 1.000000e+00 : f32
    %54 = vector.broadcast %cst_16 : f32 to vector<8x32xf32>
    %55 = arith.addf %54, %53 : vector<8x32xf32>
    %56 = arith.divf %54, %55 : vector<8x32xf32>
    %57 = vector.extract_strided_slice %19 {offsets = [0, 64], sizes = [8, 32], strides = [1, 1]} : vector<8x128xf32> to vector<8x32xf32>
    %58 = math.tanh %57 : vector<8x32xf32>
    %59 = vector.extract_strided_slice %19 {offsets = [0, 96], sizes = [8, 32], strides = [1, 1]} : vector<8x128xf32> to vector<8x32xf32>
    %60 = arith.negf %59 : vector<8x32xf32>
    %61 = math.exp %60 : vector<8x32xf32>
    %cst_17 = arith.constant 1.000000e+00 : f32
    %62 = vector.broadcast %cst_17 : f32 to vector<8x32xf32>
    %63 = arith.addf %62, %61 : vector<8x32xf32>
    %64 = arith.divf %62, %63 : vector<8x32xf32>
    %65 = arith.mulf %56, %11 : vector<8x32xf32>
    %66 = arith.mulf %50, %58 : vector<8x32xf32>
    %67 = arith.addf %65, %66 : vector<8x32xf32>
    %68 = math.tanh %67 : vector<8x32xf32>
    %69 = arith.mulf %64, %68 : vector<8x32xf32>
    %70 = tpu.concatenate %44, %69 in 1 : vector<8x32xf32>, vector<8x32xf32> -> vector<8x64xf32>
    %71 = arith.truncf %70 : vector<8x64xf32> to vector<8x64xbf16>
    %cst_18 = arith.constant dense<0.000000e+00> : vector<8x256xf32>
    %72 = tpu.matmul %71, %1, %cst_18 {dimension_numbers = #tpu.dot_dimension_numbers<[1], [0], [0], [1], [0, 0, 1, 1], [], []>} : vector<8x64xbf16>, vector<64x256xbf16>, vector<8x256xf32> -> vector<8x256xf32>
    %73 = vector.extract_strided_slice %72 {offsets = [0, 0], sizes = [8, 128], strides = [1, 1]} : vector<8x256xf32> to vector<8x128xf32>
    %74 = vector.extract_strided_slice %72 {offsets = [0, 128], sizes = [8, 128], strides = [1, 1]} : vector<8x256xf32> to vector<8x128xf32>
    %75 = vector.extract_strided_slice %9 {offsets = [1, 0, 0], sizes = [1, 8, 128], strides = [1, 1, 1]} : vector<8x8x256xf32> to vector<1x8x128xf32>
    %76 = vector.shape_cast %75 : vector<1x8x128xf32> to vector<8x128xf32>
    %77 = arith.addf %76, %73 : vector<8x128xf32>
    %78 = vector.extract_strided_slice %9 {offsets = [6, 0, 128], sizes = [1, 8, 128], strides = [1, 1, 1]} : vector<8x8x256xf32> to vector<1x8x128xf32>
    %79 = vector.shape_cast %78 : vector<1x8x128xf32> to vector<8x128xf32>
    %80 = arith.addf %79, %74 : vector<8x128xf32>
    %81 = vector.extract_strided_slice %77 {offsets = [0, 0], sizes = [8, 32], strides = [1, 1]} : vector<8x128xf32> to vector<8x32xf32>
    %82 = arith.negf %81 : vector<8x32xf32>
    %83 = math.exp %82 : vector<8x32xf32>
    %cst_19 = arith.constant 1.000000e+00 : f32
    %84 = vector.broadcast %cst_19 : f32 to vector<8x32xf32>
    %85 = arith.addf %84, %83 : vector<8x32xf32>
    %86 = arith.divf %84, %85 : vector<8x32xf32>
    %87 = vector.extract_strided_slice %77 {offsets = [0, 32], sizes = [8, 32], strides = [1, 1]} : vector<8x128xf32> to vector<8x32xf32>
    %88 = arith.negf %87 : vector<8x32xf32>
    %89 = math.exp %88 : vector<8x32xf32>
    %cst_20 = arith.constant 1.000000e+00 : f32
    %90 = vector.broadcast %cst_20 : f32 to vector<8x32xf32>
    %91 = arith.addf %90, %89 : vector<8x32xf32>
    %92 = arith.divf %90, %91 : vector<8x32xf32>
    %93 = vector.extract_strided_slice %77 {offsets = [0, 64], sizes = [8, 32], strides = [1, 1]} : vector<8x128xf32> to vector<8x32xf32>
    %94 = math.tanh %93 : vector<8x32xf32>
    %95 = vector.extract_strided_slice %77 {offsets = [0, 96], sizes = [8, 32], strides = [1, 1]} : vector<8x128xf32> to vector<8x32xf32>
    %96 = arith.negf %95 : vector<8x32xf32>
    %97 = math.exp %96 : vector<8x32xf32>
    %cst_21 = arith.constant 1.000000e+00 : f32
    %98 = vector.broadcast %cst_21 : f32 to vector<8x32xf32>
    %99 = arith.addf %98, %97 : vector<8x32xf32>
    %100 = arith.divf %98, %99 : vector<8x32xf32>
    %101 = arith.mulf %92, %42 : vector<8x32xf32>
    %102 = arith.mulf %86, %94 : vector<8x32xf32>
    %103 = arith.addf %101, %102 : vector<8x32xf32>
    %104 = math.tanh %103 : vector<8x32xf32>
    %105 = arith.mulf %100, %104 : vector<8x32xf32>
    %106 = vector.extract_strided_slice %80 {offsets = [0, 0], sizes = [8, 32], strides = [1, 1]} : vector<8x128xf32> to vector<8x32xf32>
    %107 = arith.negf %106 : vector<8x32xf32>
    %108 = math.exp %107 : vector<8x32xf32>
    %cst_22 = arith.constant 1.000000e+00 : f32
    %109 = vector.broadcast %cst_22 : f32 to vector<8x32xf32>
    %110 = arith.addf %109, %108 : vector<8x32xf32>
    %111 = arith.divf %109, %110 : vector<8x32xf32>
    %112 = vector.extract_strided_slice %80 {offsets = [0, 32], sizes = [8, 32], strides = [1, 1]} : vector<8x128xf32> to vector<8x32xf32>
    %113 = arith.negf %112 : vector<8x32xf32>
    %114 = math.exp %113 : vector<8x32xf32>
    %cst_23 = arith.constant 1.000000e+00 : f32
    %115 = vector.broadcast %cst_23 : f32 to vector<8x32xf32>
    %116 = arith.addf %115, %114 : vector<8x32xf32>
    %117 = arith.divf %115, %116 : vector<8x32xf32>
    %118 = vector.extract_strided_slice %80 {offsets = [0, 64], sizes = [8, 32], strides = [1, 1]} : vector<8x128xf32> to vector<8x32xf32>
    %119 = math.tanh %118 : vector<8x32xf32>
    %120 = vector.extract_strided_slice %80 {offsets = [0, 96], sizes = [8, 32], strides = [1, 1]} : vector<8x128xf32> to vector<8x32xf32>
    %121 = arith.negf %120 : vector<8x32xf32>
    %122 = math.exp %121 : vector<8x32xf32>
    %cst_24 = arith.constant 1.000000e+00 : f32
    %123 = vector.broadcast %cst_24 : f32 to vector<8x32xf32>
    %124 = arith.addf %123, %122 : vector<8x32xf32>
    %125 = arith.divf %123, %124 : vector<8x32xf32>
    %126 = arith.mulf %117, %67 : vector<8x32xf32>
    %127 = arith.mulf %111, %119 : vector<8x32xf32>
    %128 = arith.addf %126, %127 : vector<8x32xf32>
    %129 = math.tanh %128 : vector<8x32xf32>
    %130 = arith.mulf %125, %129 : vector<8x32xf32>
    %131 = arith.maximumf %44, %105 : vector<8x32xf32>
    %132 = arith.maximumf %69, %130 : vector<8x32xf32>
    %133 = tpu.concatenate %105, %130 in 1 : vector<8x32xf32>, vector<8x32xf32> -> vector<8x64xf32>
    %134 = arith.truncf %133 : vector<8x64xf32> to vector<8x64xbf16>
    %cst_25 = arith.constant dense<0.000000e+00> : vector<8x256xf32>
    %135 = tpu.matmul %134, %1, %cst_25 {dimension_numbers = #tpu.dot_dimension_numbers<[1], [0], [0], [1], [0, 0, 1, 1], [], []>} : vector<8x64xbf16>, vector<64x256xbf16>, vector<8x256xf32> -> vector<8x256xf32>
    %136 = vector.extract_strided_slice %135 {offsets = [0, 0], sizes = [8, 128], strides = [1, 1]} : vector<8x256xf32> to vector<8x128xf32>
    %137 = vector.extract_strided_slice %135 {offsets = [0, 128], sizes = [8, 128], strides = [1, 1]} : vector<8x256xf32> to vector<8x128xf32>
    %138 = vector.extract_strided_slice %9 {offsets = [2, 0, 0], sizes = [1, 8, 128], strides = [1, 1, 1]} : vector<8x8x256xf32> to vector<1x8x128xf32>
    %139 = vector.shape_cast %138 : vector<1x8x128xf32> to vector<8x128xf32>
    %140 = arith.addf %139, %136 : vector<8x128xf32>
    %141 = vector.extract_strided_slice %9 {offsets = [5, 0, 128], sizes = [1, 8, 128], strides = [1, 1, 1]} : vector<8x8x256xf32> to vector<1x8x128xf32>
    %142 = vector.shape_cast %141 : vector<1x8x128xf32> to vector<8x128xf32>
    %143 = arith.addf %142, %137 : vector<8x128xf32>
    %144 = vector.extract_strided_slice %140 {offsets = [0, 0], sizes = [8, 32], strides = [1, 1]} : vector<8x128xf32> to vector<8x32xf32>
    %145 = arith.negf %144 : vector<8x32xf32>
    %146 = math.exp %145 : vector<8x32xf32>
    %cst_26 = arith.constant 1.000000e+00 : f32
    %147 = vector.broadcast %cst_26 : f32 to vector<8x32xf32>
    %148 = arith.addf %147, %146 : vector<8x32xf32>
    %149 = arith.divf %147, %148 : vector<8x32xf32>
    %150 = vector.extract_strided_slice %140 {offsets = [0, 32], sizes = [8, 32], strides = [1, 1]} : vector<8x128xf32> to vector<8x32xf32>
    %151 = arith.negf %150 : vector<8x32xf32>
    %152 = math.exp %151 : vector<8x32xf32>
    %cst_27 = arith.constant 1.000000e+00 : f32
    %153 = vector.broadcast %cst_27 : f32 to vector<8x32xf32>
    %154 = arith.addf %153, %152 : vector<8x32xf32>
    %155 = arith.divf %153, %154 : vector<8x32xf32>
    %156 = vector.extract_strided_slice %140 {offsets = [0, 64], sizes = [8, 32], strides = [1, 1]} : vector<8x128xf32> to vector<8x32xf32>
    %157 = math.tanh %156 : vector<8x32xf32>
    %158 = vector.extract_strided_slice %140 {offsets = [0, 96], sizes = [8, 32], strides = [1, 1]} : vector<8x128xf32> to vector<8x32xf32>
    %159 = arith.negf %158 : vector<8x32xf32>
    %160 = math.exp %159 : vector<8x32xf32>
    %cst_28 = arith.constant 1.000000e+00 : f32
    %161 = vector.broadcast %cst_28 : f32 to vector<8x32xf32>
    %162 = arith.addf %161, %160 : vector<8x32xf32>
    %163 = arith.divf %161, %162 : vector<8x32xf32>
    %164 = arith.mulf %155, %103 : vector<8x32xf32>
    %165 = arith.mulf %149, %157 : vector<8x32xf32>
    %166 = arith.addf %164, %165 : vector<8x32xf32>
    %167 = math.tanh %166 : vector<8x32xf32>
    %168 = arith.mulf %163, %167 : vector<8x32xf32>
    %169 = vector.extract_strided_slice %143 {offsets = [0, 0], sizes = [8, 32], strides = [1, 1]} : vector<8x128xf32> to vector<8x32xf32>
    %170 = arith.negf %169 : vector<8x32xf32>
    %171 = math.exp %170 : vector<8x32xf32>
    %cst_29 = arith.constant 1.000000e+00 : f32
    %172 = vector.broadcast %cst_29 : f32 to vector<8x32xf32>
    %173 = arith.addf %172, %171 : vector<8x32xf32>
    %174 = arith.divf %172, %173 : vector<8x32xf32>
    %175 = vector.extract_strided_slice %143 {offsets = [0, 32], sizes = [8, 32], strides = [1, 1]} : vector<8x128xf32> to vector<8x32xf32>
    %176 = arith.negf %175 : vector<8x32xf32>
    %177 = math.exp %176 : vector<8x32xf32>
    %cst_30 = arith.constant 1.000000e+00 : f32
    %178 = vector.broadcast %cst_30 : f32 to vector<8x32xf32>
    %179 = arith.addf %178, %177 : vector<8x32xf32>
    %180 = arith.divf %178, %179 : vector<8x32xf32>
    %181 = vector.extract_strided_slice %143 {offsets = [0, 64], sizes = [8, 32], strides = [1, 1]} : vector<8x128xf32> to vector<8x32xf32>
    %182 = math.tanh %181 : vector<8x32xf32>
    %183 = vector.extract_strided_slice %143 {offsets = [0, 96], sizes = [8, 32], strides = [1, 1]} : vector<8x128xf32> to vector<8x32xf32>
    %184 = arith.negf %183 : vector<8x32xf32>
    %185 = math.exp %184 : vector<8x32xf32>
    %cst_31 = arith.constant 1.000000e+00 : f32
    %186 = vector.broadcast %cst_31 : f32 to vector<8x32xf32>
    %187 = arith.addf %186, %185 : vector<8x32xf32>
    %188 = arith.divf %186, %187 : vector<8x32xf32>
    %189 = arith.mulf %180, %128 : vector<8x32xf32>
    %190 = arith.mulf %174, %182 : vector<8x32xf32>
    %191 = arith.addf %189, %190 : vector<8x32xf32>
    %192 = math.tanh %191 : vector<8x32xf32>
    %193 = arith.mulf %188, %192 : vector<8x32xf32>
    %194 = arith.maximumf %131, %168 : vector<8x32xf32>
    %195 = arith.maximumf %132, %193 : vector<8x32xf32>
    %196 = tpu.concatenate %168, %193 in 1 : vector<8x32xf32>, vector<8x32xf32> -> vector<8x64xf32>
    %197 = arith.truncf %196 : vector<8x64xf32> to vector<8x64xbf16>
    %cst_32 = arith.constant dense<0.000000e+00> : vector<8x256xf32>
    %198 = tpu.matmul %197, %1, %cst_32 {dimension_numbers = #tpu.dot_dimension_numbers<[1], [0], [0], [1], [0, 0, 1, 1], [], []>} : vector<8x64xbf16>, vector<64x256xbf16>, vector<8x256xf32> -> vector<8x256xf32>
    %199 = vector.extract_strided_slice %198 {offsets = [0, 0], sizes = [8, 128], strides = [1, 1]} : vector<8x256xf32> to vector<8x128xf32>
    %200 = vector.extract_strided_slice %198 {offsets = [0, 128], sizes = [8, 128], strides = [1, 1]} : vector<8x256xf32> to vector<8x128xf32>
    %201 = vector.extract_strided_slice %9 {offsets = [3, 0, 0], sizes = [1, 8, 128], strides = [1, 1, 1]} : vector<8x8x256xf32> to vector<1x8x128xf32>
    %202 = vector.shape_cast %201 : vector<1x8x128xf32> to vector<8x128xf32>
    %203 = arith.addf %202, %199 : vector<8x128xf32>
    %204 = vector.extract_strided_slice %9 {offsets = [4, 0, 128], sizes = [1, 8, 128], strides = [1, 1, 1]} : vector<8x8x256xf32> to vector<1x8x128xf32>
    %205 = vector.shape_cast %204 : vector<1x8x128xf32> to vector<8x128xf32>
    %206 = arith.addf %205, %200 : vector<8x128xf32>
    %207 = vector.extract_strided_slice %203 {offsets = [0, 0], sizes = [8, 32], strides = [1, 1]} : vector<8x128xf32> to vector<8x32xf32>
    %208 = arith.negf %207 : vector<8x32xf32>
    %209 = math.exp %208 : vector<8x32xf32>
    %cst_33 = arith.constant 1.000000e+00 : f32
    %210 = vector.broadcast %cst_33 : f32 to vector<8x32xf32>
    %211 = arith.addf %210, %209 : vector<8x32xf32>
    %212 = arith.divf %210, %211 : vector<8x32xf32>
    %213 = vector.extract_strided_slice %203 {offsets = [0, 32], sizes = [8, 32], strides = [1, 1]} : vector<8x128xf32> to vector<8x32xf32>
    %214 = arith.negf %213 : vector<8x32xf32>
    %215 = math.exp %214 : vector<8x32xf32>
    %cst_34 = arith.constant 1.000000e+00 : f32
    %216 = vector.broadcast %cst_34 : f32 to vector<8x32xf32>
    %217 = arith.addf %216, %215 : vector<8x32xf32>
    %218 = arith.divf %216, %217 : vector<8x32xf32>
    %219 = vector.extract_strided_slice %203 {offsets = [0, 64], sizes = [8, 32], strides = [1, 1]} : vector<8x128xf32> to vector<8x32xf32>
    %220 = math.tanh %219 : vector<8x32xf32>
    %221 = vector.extract_strided_slice %203 {offsets = [0, 96], sizes = [8, 32], strides = [1, 1]} : vector<8x128xf32> to vector<8x32xf32>
    %222 = arith.negf %221 : vector<8x32xf32>
    %223 = math.exp %222 : vector<8x32xf32>
    %cst_35 = arith.constant 1.000000e+00 : f32
    %224 = vector.broadcast %cst_35 : f32 to vector<8x32xf32>
    %225 = arith.addf %224, %223 : vector<8x32xf32>
    %226 = arith.divf %224, %225 : vector<8x32xf32>
    %227 = arith.mulf %218, %166 : vector<8x32xf32>
    %228 = arith.mulf %212, %220 : vector<8x32xf32>
    %229 = arith.addf %227, %228 : vector<8x32xf32>
    %230 = math.tanh %229 : vector<8x32xf32>
    %231 = arith.mulf %226, %230 : vector<8x32xf32>
    %232 = vector.extract_strided_slice %206 {offsets = [0, 0], sizes = [8, 32], strides = [1, 1]} : vector<8x128xf32> to vector<8x32xf32>
    %233 = arith.negf %232 : vector<8x32xf32>
    %234 = math.exp %233 : vector<8x32xf32>
    %cst_36 = arith.constant 1.000000e+00 : f32
    %235 = vector.broadcast %cst_36 : f32 to vector<8x32xf32>
    %236 = arith.addf %235, %234 : vector<8x32xf32>
    %237 = arith.divf %235, %236 : vector<8x32xf32>
    %238 = vector.extract_strided_slice %206 {offsets = [0, 32], sizes = [8, 32], strides = [1, 1]} : vector<8x128xf32> to vector<8x32xf32>
    %239 = arith.negf %238 : vector<8x32xf32>
    %240 = math.exp %239 : vector<8x32xf32>
    %cst_37 = arith.constant 1.000000e+00 : f32
    %241 = vector.broadcast %cst_37 : f32 to vector<8x32xf32>
    %242 = arith.addf %241, %240 : vector<8x32xf32>
    %243 = arith.divf %241, %242 : vector<8x32xf32>
    %244 = vector.extract_strided_slice %206 {offsets = [0, 64], sizes = [8, 32], strides = [1, 1]} : vector<8x128xf32> to vector<8x32xf32>
    %245 = math.tanh %244 : vector<8x32xf32>
    %246 = vector.extract_strided_slice %206 {offsets = [0, 96], sizes = [8, 32], strides = [1, 1]} : vector<8x128xf32> to vector<8x32xf32>
    %247 = arith.negf %246 : vector<8x32xf32>
    %248 = math.exp %247 : vector<8x32xf32>
    %cst_38 = arith.constant 1.000000e+00 : f32
    %249 = vector.broadcast %cst_38 : f32 to vector<8x32xf32>
    %250 = arith.addf %249, %248 : vector<8x32xf32>
    %251 = arith.divf %249, %250 : vector<8x32xf32>
    %252 = arith.mulf %243, %191 : vector<8x32xf32>
    %253 = arith.mulf %237, %245 : vector<8x32xf32>
    %254 = arith.addf %252, %253 : vector<8x32xf32>
    %255 = math.tanh %254 : vector<8x32xf32>
    %256 = arith.mulf %251, %255 : vector<8x32xf32>
    %257 = arith.maximumf %194, %231 : vector<8x32xf32>
    %258 = arith.maximumf %195, %256 : vector<8x32xf32>
    %259 = tpu.concatenate %231, %256 in 1 : vector<8x32xf32>, vector<8x32xf32> -> vector<8x64xf32>
    %260 = arith.truncf %259 : vector<8x64xf32> to vector<8x64xbf16>
    %cst_39 = arith.constant dense<0.000000e+00> : vector<8x256xf32>
    %261 = tpu.matmul %260, %1, %cst_39 {dimension_numbers = #tpu.dot_dimension_numbers<[1], [0], [0], [1], [0, 0, 1, 1], [], []>} : vector<8x64xbf16>, vector<64x256xbf16>, vector<8x256xf32> -> vector<8x256xf32>
    %262 = vector.extract_strided_slice %261 {offsets = [0, 0], sizes = [8, 128], strides = [1, 1]} : vector<8x256xf32> to vector<8x128xf32>
    %263 = vector.extract_strided_slice %261 {offsets = [0, 128], sizes = [8, 128], strides = [1, 1]} : vector<8x256xf32> to vector<8x128xf32>
    %264 = vector.extract_strided_slice %9 {offsets = [4, 0, 0], sizes = [1, 8, 128], strides = [1, 1, 1]} : vector<8x8x256xf32> to vector<1x8x128xf32>
    %265 = vector.shape_cast %264 : vector<1x8x128xf32> to vector<8x128xf32>
    %266 = arith.addf %265, %262 : vector<8x128xf32>
    %267 = vector.extract_strided_slice %9 {offsets = [3, 0, 128], sizes = [1, 8, 128], strides = [1, 1, 1]} : vector<8x8x256xf32> to vector<1x8x128xf32>
    %268 = vector.shape_cast %267 : vector<1x8x128xf32> to vector<8x128xf32>
    %269 = arith.addf %268, %263 : vector<8x128xf32>
    %270 = vector.extract_strided_slice %266 {offsets = [0, 0], sizes = [8, 32], strides = [1, 1]} : vector<8x128xf32> to vector<8x32xf32>
    %271 = arith.negf %270 : vector<8x32xf32>
    %272 = math.exp %271 : vector<8x32xf32>
    %cst_40 = arith.constant 1.000000e+00 : f32
    %273 = vector.broadcast %cst_40 : f32 to vector<8x32xf32>
    %274 = arith.addf %273, %272 : vector<8x32xf32>
    %275 = arith.divf %273, %274 : vector<8x32xf32>
    %276 = vector.extract_strided_slice %266 {offsets = [0, 32], sizes = [8, 32], strides = [1, 1]} : vector<8x128xf32> to vector<8x32xf32>
    %277 = arith.negf %276 : vector<8x32xf32>
    %278 = math.exp %277 : vector<8x32xf32>
    %cst_41 = arith.constant 1.000000e+00 : f32
    %279 = vector.broadcast %cst_41 : f32 to vector<8x32xf32>
    %280 = arith.addf %279, %278 : vector<8x32xf32>
    %281 = arith.divf %279, %280 : vector<8x32xf32>
    %282 = vector.extract_strided_slice %266 {offsets = [0, 64], sizes = [8, 32], strides = [1, 1]} : vector<8x128xf32> to vector<8x32xf32>
    %283 = math.tanh %282 : vector<8x32xf32>
    %284 = vector.extract_strided_slice %266 {offsets = [0, 96], sizes = [8, 32], strides = [1, 1]} : vector<8x128xf32> to vector<8x32xf32>
    %285 = arith.negf %284 : vector<8x32xf32>
    %286 = math.exp %285 : vector<8x32xf32>
    %cst_42 = arith.constant 1.000000e+00 : f32
    %287 = vector.broadcast %cst_42 : f32 to vector<8x32xf32>
    %288 = arith.addf %287, %286 : vector<8x32xf32>
    %289 = arith.divf %287, %288 : vector<8x32xf32>
    %290 = arith.mulf %281, %229 : vector<8x32xf32>
    %291 = arith.mulf %275, %283 : vector<8x32xf32>
    %292 = arith.addf %290, %291 : vector<8x32xf32>
    %293 = math.tanh %292 : vector<8x32xf32>
    %294 = arith.mulf %289, %293 : vector<8x32xf32>
    %295 = vector.extract_strided_slice %269 {offsets = [0, 0], sizes = [8, 32], strides = [1, 1]} : vector<8x128xf32> to vector<8x32xf32>
    %296 = arith.negf %295 : vector<8x32xf32>
    %297 = math.exp %296 : vector<8x32xf32>
    %cst_43 = arith.constant 1.000000e+00 : f32
    %298 = vector.broadcast %cst_43 : f32 to vector<8x32xf32>
    %299 = arith.addf %298, %297 : vector<8x32xf32>
    %300 = arith.divf %298, %299 : vector<8x32xf32>
    %301 = vector.extract_strided_slice %269 {offsets = [0, 32], sizes = [8, 32], strides = [1, 1]} : vector<8x128xf32> to vector<8x32xf32>
    %302 = arith.negf %301 : vector<8x32xf32>
    %303 = math.exp %302 : vector<8x32xf32>
    %cst_44 = arith.constant 1.000000e+00 : f32
    %304 = vector.broadcast %cst_44 : f32 to vector<8x32xf32>
    %305 = arith.addf %304, %303 : vector<8x32xf32>
    %306 = arith.divf %304, %305 : vector<8x32xf32>
    %307 = vector.extract_strided_slice %269 {offsets = [0, 64], sizes = [8, 32], strides = [1, 1]} : vector<8x128xf32> to vector<8x32xf32>
    %308 = math.tanh %307 : vector<8x32xf32>
    %309 = vector.extract_strided_slice %269 {offsets = [0, 96], sizes = [8, 32], strides = [1, 1]} : vector<8x128xf32> to vector<8x32xf32>
    %310 = arith.negf %309 : vector<8x32xf32>
    %311 = math.exp %310 : vector<8x32xf32>
    %cst_45 = arith.constant 1.000000e+00 : f32
    %312 = vector.broadcast %cst_45 : f32 to vector<8x32xf32>
    %313 = arith.addf %312, %311 : vector<8x32xf32>
    %314 = arith.divf %312, %313 : vector<8x32xf32>
    %315 = arith.mulf %306, %254 : vector<8x32xf32>
    %316 = arith.mulf %300, %308 : vector<8x32xf32>
    %317 = arith.addf %315, %316 : vector<8x32xf32>
    %318 = math.tanh %317 : vector<8x32xf32>
    %319 = arith.mulf %314, %318 : vector<8x32xf32>
    %320 = arith.maximumf %257, %294 : vector<8x32xf32>
    %321 = arith.maximumf %258, %319 : vector<8x32xf32>
    %322 = tpu.concatenate %294, %319 in 1 : vector<8x32xf32>, vector<8x32xf32> -> vector<8x64xf32>
    %323 = arith.truncf %322 : vector<8x64xf32> to vector<8x64xbf16>
    %cst_46 = arith.constant dense<0.000000e+00> : vector<8x256xf32>
    %324 = tpu.matmul %323, %1, %cst_46 {dimension_numbers = #tpu.dot_dimension_numbers<[1], [0], [0], [1], [0, 0, 1, 1], [], []>} : vector<8x64xbf16>, vector<64x256xbf16>, vector<8x256xf32> -> vector<8x256xf32>
    %325 = vector.extract_strided_slice %324 {offsets = [0, 0], sizes = [8, 128], strides = [1, 1]} : vector<8x256xf32> to vector<8x128xf32>
    %326 = vector.extract_strided_slice %324 {offsets = [0, 128], sizes = [8, 128], strides = [1, 1]} : vector<8x256xf32> to vector<8x128xf32>
    %327 = vector.extract_strided_slice %9 {offsets = [5, 0, 0], sizes = [1, 8, 128], strides = [1, 1, 1]} : vector<8x8x256xf32> to vector<1x8x128xf32>
    %328 = vector.shape_cast %327 : vector<1x8x128xf32> to vector<8x128xf32>
    %329 = arith.addf %328, %325 : vector<8x128xf32>
    %330 = vector.extract_strided_slice %9 {offsets = [2, 0, 128], sizes = [1, 8, 128], strides = [1, 1, 1]} : vector<8x8x256xf32> to vector<1x8x128xf32>
    %331 = vector.shape_cast %330 : vector<1x8x128xf32> to vector<8x128xf32>
    %332 = arith.addf %331, %326 : vector<8x128xf32>
    %333 = vector.extract_strided_slice %329 {offsets = [0, 0], sizes = [8, 32], strides = [1, 1]} : vector<8x128xf32> to vector<8x32xf32>
    %334 = arith.negf %333 : vector<8x32xf32>
    %335 = math.exp %334 : vector<8x32xf32>
    %cst_47 = arith.constant 1.000000e+00 : f32
    %336 = vector.broadcast %cst_47 : f32 to vector<8x32xf32>
    %337 = arith.addf %336, %335 : vector<8x32xf32>
    %338 = arith.divf %336, %337 : vector<8x32xf32>
    %339 = vector.extract_strided_slice %329 {offsets = [0, 32], sizes = [8, 32], strides = [1, 1]} : vector<8x128xf32> to vector<8x32xf32>
    %340 = arith.negf %339 : vector<8x32xf32>
    %341 = math.exp %340 : vector<8x32xf32>
    %cst_48 = arith.constant 1.000000e+00 : f32
    %342 = vector.broadcast %cst_48 : f32 to vector<8x32xf32>
    %343 = arith.addf %342, %341 : vector<8x32xf32>
    %344 = arith.divf %342, %343 : vector<8x32xf32>
    %345 = vector.extract_strided_slice %329 {offsets = [0, 64], sizes = [8, 32], strides = [1, 1]} : vector<8x128xf32> to vector<8x32xf32>
    %346 = math.tanh %345 : vector<8x32xf32>
    %347 = vector.extract_strided_slice %329 {offsets = [0, 96], sizes = [8, 32], strides = [1, 1]} : vector<8x128xf32> to vector<8x32xf32>
    %348 = arith.negf %347 : vector<8x32xf32>
    %349 = math.exp %348 : vector<8x32xf32>
    %cst_49 = arith.constant 1.000000e+00 : f32
    %350 = vector.broadcast %cst_49 : f32 to vector<8x32xf32>
    %351 = arith.addf %350, %349 : vector<8x32xf32>
    %352 = arith.divf %350, %351 : vector<8x32xf32>
    %353 = arith.mulf %344, %292 : vector<8x32xf32>
    %354 = arith.mulf %338, %346 : vector<8x32xf32>
    %355 = arith.addf %353, %354 : vector<8x32xf32>
    %356 = math.tanh %355 : vector<8x32xf32>
    %357 = arith.mulf %352, %356 : vector<8x32xf32>
    %358 = vector.extract_strided_slice %332 {offsets = [0, 0], sizes = [8, 32], strides = [1, 1]} : vector<8x128xf32> to vector<8x32xf32>
    %359 = arith.negf %358 : vector<8x32xf32>
    %360 = math.exp %359 : vector<8x32xf32>
    %cst_50 = arith.constant 1.000000e+00 : f32
    %361 = vector.broadcast %cst_50 : f32 to vector<8x32xf32>
    %362 = arith.addf %361, %360 : vector<8x32xf32>
    %363 = arith.divf %361, %362 : vector<8x32xf32>
    %364 = vector.extract_strided_slice %332 {offsets = [0, 32], sizes = [8, 32], strides = [1, 1]} : vector<8x128xf32> to vector<8x32xf32>
    %365 = arith.negf %364 : vector<8x32xf32>
    %366 = math.exp %365 : vector<8x32xf32>
    %cst_51 = arith.constant 1.000000e+00 : f32
    %367 = vector.broadcast %cst_51 : f32 to vector<8x32xf32>
    %368 = arith.addf %367, %366 : vector<8x32xf32>
    %369 = arith.divf %367, %368 : vector<8x32xf32>
    %370 = vector.extract_strided_slice %332 {offsets = [0, 64], sizes = [8, 32], strides = [1, 1]} : vector<8x128xf32> to vector<8x32xf32>
    %371 = math.tanh %370 : vector<8x32xf32>
    %372 = vector.extract_strided_slice %332 {offsets = [0, 96], sizes = [8, 32], strides = [1, 1]} : vector<8x128xf32> to vector<8x32xf32>
    %373 = arith.negf %372 : vector<8x32xf32>
    %374 = math.exp %373 : vector<8x32xf32>
    %cst_52 = arith.constant 1.000000e+00 : f32
    %375 = vector.broadcast %cst_52 : f32 to vector<8x32xf32>
    %376 = arith.addf %375, %374 : vector<8x32xf32>
    %377 = arith.divf %375, %376 : vector<8x32xf32>
    %378 = arith.mulf %369, %317 : vector<8x32xf32>
    %379 = arith.mulf %363, %371 : vector<8x32xf32>
    %380 = arith.addf %378, %379 : vector<8x32xf32>
    %381 = math.tanh %380 : vector<8x32xf32>
    %382 = arith.mulf %377, %381 : vector<8x32xf32>
    %383 = arith.maximumf %320, %357 : vector<8x32xf32>
    %384 = arith.maximumf %321, %382 : vector<8x32xf32>
    %385 = tpu.concatenate %357, %382 in 1 : vector<8x32xf32>, vector<8x32xf32> -> vector<8x64xf32>
    %386 = arith.truncf %385 : vector<8x64xf32> to vector<8x64xbf16>
    %cst_53 = arith.constant dense<0.000000e+00> : vector<8x256xf32>
    %387 = tpu.matmul %386, %1, %cst_53 {dimension_numbers = #tpu.dot_dimension_numbers<[1], [0], [0], [1], [0, 0, 1, 1], [], []>} : vector<8x64xbf16>, vector<64x256xbf16>, vector<8x256xf32> -> vector<8x256xf32>
    %388 = vector.extract_strided_slice %387 {offsets = [0, 0], sizes = [8, 128], strides = [1, 1]} : vector<8x256xf32> to vector<8x128xf32>
    %389 = vector.extract_strided_slice %387 {offsets = [0, 128], sizes = [8, 128], strides = [1, 1]} : vector<8x256xf32> to vector<8x128xf32>
    %390 = vector.extract_strided_slice %9 {offsets = [6, 0, 0], sizes = [1, 8, 128], strides = [1, 1, 1]} : vector<8x8x256xf32> to vector<1x8x128xf32>
    %391 = vector.shape_cast %390 : vector<1x8x128xf32> to vector<8x128xf32>
    %392 = arith.addf %391, %388 : vector<8x128xf32>
    %393 = vector.extract_strided_slice %9 {offsets = [1, 0, 128], sizes = [1, 8, 128], strides = [1, 1, 1]} : vector<8x8x256xf32> to vector<1x8x128xf32>
    %394 = vector.shape_cast %393 : vector<1x8x128xf32> to vector<8x128xf32>
    %395 = arith.addf %394, %389 : vector<8x128xf32>
    %396 = vector.extract_strided_slice %392 {offsets = [0, 0], sizes = [8, 32], strides = [1, 1]} : vector<8x128xf32> to vector<8x32xf32>
    %397 = arith.negf %396 : vector<8x32xf32>
    %398 = math.exp %397 : vector<8x32xf32>
    %cst_54 = arith.constant 1.000000e+00 : f32
    %399 = vector.broadcast %cst_54 : f32 to vector<8x32xf32>
    %400 = arith.addf %399, %398 : vector<8x32xf32>
    %401 = arith.divf %399, %400 : vector<8x32xf32>
    %402 = vector.extract_strided_slice %392 {offsets = [0, 32], sizes = [8, 32], strides = [1, 1]} : vector<8x128xf32> to vector<8x32xf32>
    %403 = arith.negf %402 : vector<8x32xf32>
    %404 = math.exp %403 : vector<8x32xf32>
    %cst_55 = arith.constant 1.000000e+00 : f32
    %405 = vector.broadcast %cst_55 : f32 to vector<8x32xf32>
    %406 = arith.addf %405, %404 : vector<8x32xf32>
    %407 = arith.divf %405, %406 : vector<8x32xf32>
    %408 = vector.extract_strided_slice %392 {offsets = [0, 64], sizes = [8, 32], strides = [1, 1]} : vector<8x128xf32> to vector<8x32xf32>
    %409 = math.tanh %408 : vector<8x32xf32>
    %410 = vector.extract_strided_slice %392 {offsets = [0, 96], sizes = [8, 32], strides = [1, 1]} : vector<8x128xf32> to vector<8x32xf32>
    %411 = arith.negf %410 : vector<8x32xf32>
    %412 = math.exp %411 : vector<8x32xf32>
    %cst_56 = arith.constant 1.000000e+00 : f32
    %413 = vector.broadcast %cst_56 : f32 to vector<8x32xf32>
    %414 = arith.addf %413, %412 : vector<8x32xf32>
    %415 = arith.divf %413, %414 : vector<8x32xf32>
    %416 = arith.mulf %407, %355 : vector<8x32xf32>
    %417 = arith.mulf %401, %409 : vector<8x32xf32>
    %418 = arith.addf %416, %417 : vector<8x32xf32>
    %419 = math.tanh %418 : vector<8x32xf32>
    %420 = arith.mulf %415, %419 : vector<8x32xf32>
    %421 = vector.extract_strided_slice %395 {offsets = [0, 0], sizes = [8, 32], strides = [1, 1]} : vector<8x128xf32> to vector<8x32xf32>
    %422 = arith.negf %421 : vector<8x32xf32>
    %423 = math.exp %422 : vector<8x32xf32>
    %cst_57 = arith.constant 1.000000e+00 : f32
    %424 = vector.broadcast %cst_57 : f32 to vector<8x32xf32>
    %425 = arith.addf %424, %423 : vector<8x32xf32>
    %426 = arith.divf %424, %425 : vector<8x32xf32>
    %427 = vector.extract_strided_slice %395 {offsets = [0, 32], sizes = [8, 32], strides = [1, 1]} : vector<8x128xf32> to vector<8x32xf32>
    %428 = arith.negf %427 : vector<8x32xf32>
    %429 = math.exp %428 : vector<8x32xf32>
    %cst_58 = arith.constant 1.000000e+00 : f32
    %430 = vector.broadcast %cst_58 : f32 to vector<8x32xf32>
    %431 = arith.addf %430, %429 : vector<8x32xf32>
    %432 = arith.divf %430, %431 : vector<8x32xf32>
    %433 = vector.extract_strided_slice %395 {offsets = [0, 64], sizes = [8, 32], strides = [1, 1]} : vector<8x128xf32> to vector<8x32xf32>
    %434 = math.tanh %433 : vector<8x32xf32>
    %435 = vector.extract_strided_slice %395 {offsets = [0, 96], sizes = [8, 32], strides = [1, 1]} : vector<8x128xf32> to vector<8x32xf32>
    %436 = arith.negf %435 : vector<8x32xf32>
    %437 = math.exp %436 : vector<8x32xf32>
    %cst_59 = arith.constant 1.000000e+00 : f32
    %438 = vector.broadcast %cst_59 : f32 to vector<8x32xf32>
    %439 = arith.addf %438, %437 : vector<8x32xf32>
    %440 = arith.divf %438, %439 : vector<8x32xf32>
    %441 = arith.mulf %432, %380 : vector<8x32xf32>
    %442 = arith.mulf %426, %434 : vector<8x32xf32>
    %443 = arith.addf %441, %442 : vector<8x32xf32>
    %444 = math.tanh %443 : vector<8x32xf32>
    %445 = arith.mulf %440, %444 : vector<8x32xf32>
    %446 = arith.maximumf %383, %420 : vector<8x32xf32>
    %447 = arith.maximumf %384, %445 : vector<8x32xf32>
    %448 = tpu.concatenate %420, %445 in 1 : vector<8x32xf32>, vector<8x32xf32> -> vector<8x64xf32>
    %449 = arith.truncf %448 : vector<8x64xf32> to vector<8x64xbf16>
    %cst_60 = arith.constant dense<0.000000e+00> : vector<8x256xf32>
    %450 = tpu.matmul %449, %1, %cst_60 {dimension_numbers = #tpu.dot_dimension_numbers<[1], [0], [0], [1], [0, 0, 1, 1], [], []>} : vector<8x64xbf16>, vector<64x256xbf16>, vector<8x256xf32> -> vector<8x256xf32>
    %451 = vector.extract_strided_slice %450 {offsets = [0, 0], sizes = [8, 128], strides = [1, 1]} : vector<8x256xf32> to vector<8x128xf32>
    %452 = vector.extract_strided_slice %450 {offsets = [0, 128], sizes = [8, 128], strides = [1, 1]} : vector<8x256xf32> to vector<8x128xf32>
    %453 = vector.extract_strided_slice %9 {offsets = [7, 0, 0], sizes = [1, 8, 128], strides = [1, 1, 1]} : vector<8x8x256xf32> to vector<1x8x128xf32>
    %454 = vector.shape_cast %453 : vector<1x8x128xf32> to vector<8x128xf32>
    %455 = arith.addf %454, %451 : vector<8x128xf32>
    %456 = vector.extract_strided_slice %9 {offsets = [0, 0, 128], sizes = [1, 8, 128], strides = [1, 1, 1]} : vector<8x8x256xf32> to vector<1x8x128xf32>
    %457 = vector.shape_cast %456 : vector<1x8x128xf32> to vector<8x128xf32>
    %458 = arith.addf %457, %452 : vector<8x128xf32>
    %459 = vector.extract_strided_slice %455 {offsets = [0, 0], sizes = [8, 32], strides = [1, 1]} : vector<8x128xf32> to vector<8x32xf32>
    %460 = arith.negf %459 : vector<8x32xf32>
    %461 = math.exp %460 : vector<8x32xf32>
    %cst_61 = arith.constant 1.000000e+00 : f32
    %462 = vector.broadcast %cst_61 : f32 to vector<8x32xf32>
    %463 = arith.addf %462, %461 : vector<8x32xf32>
    %464 = arith.divf %462, %463 : vector<8x32xf32>
    %465 = vector.extract_strided_slice %455 {offsets = [0, 32], sizes = [8, 32], strides = [1, 1]} : vector<8x128xf32> to vector<8x32xf32>
    %466 = arith.negf %465 : vector<8x32xf32>
    %467 = math.exp %466 : vector<8x32xf32>
    %cst_62 = arith.constant 1.000000e+00 : f32
    %468 = vector.broadcast %cst_62 : f32 to vector<8x32xf32>
    %469 = arith.addf %468, %467 : vector<8x32xf32>
    %470 = arith.divf %468, %469 : vector<8x32xf32>
    %471 = vector.extract_strided_slice %455 {offsets = [0, 64], sizes = [8, 32], strides = [1, 1]} : vector<8x128xf32> to vector<8x32xf32>
    %472 = math.tanh %471 : vector<8x32xf32>
    %473 = vector.extract_strided_slice %455 {offsets = [0, 96], sizes = [8, 32], strides = [1, 1]} : vector<8x128xf32> to vector<8x32xf32>
    %474 = arith.negf %473 : vector<8x32xf32>
    %475 = math.exp %474 : vector<8x32xf32>
    %cst_63 = arith.constant 1.000000e+00 : f32
    %476 = vector.broadcast %cst_63 : f32 to vector<8x32xf32>
    %477 = arith.addf %476, %475 : vector<8x32xf32>
    %478 = arith.divf %476, %477 : vector<8x32xf32>
    %479 = arith.mulf %470, %418 : vector<8x32xf32>
    %480 = arith.mulf %464, %472 : vector<8x32xf32>
    %481 = arith.addf %479, %480 : vector<8x32xf32>
    %482 = math.tanh %481 : vector<8x32xf32>
    %483 = arith.mulf %478, %482 : vector<8x32xf32>
    %484 = vector.extract_strided_slice %458 {offsets = [0, 0], sizes = [8, 32], strides = [1, 1]} : vector<8x128xf32> to vector<8x32xf32>
    %485 = arith.negf %484 : vector<8x32xf32>
    %486 = math.exp %485 : vector<8x32xf32>
    %cst_64 = arith.constant 1.000000e+00 : f32
    %487 = vector.broadcast %cst_64 : f32 to vector<8x32xf32>
    %488 = arith.addf %487, %486 : vector<8x32xf32>
    %489 = arith.divf %487, %488 : vector<8x32xf32>
    %490 = vector.extract_strided_slice %458 {offsets = [0, 32], sizes = [8, 32], strides = [1, 1]} : vector<8x128xf32> to vector<8x32xf32>
    %491 = arith.negf %490 : vector<8x32xf32>
    %492 = math.exp %491 : vector<8x32xf32>
    %cst_65 = arith.constant 1.000000e+00 : f32
    %493 = vector.broadcast %cst_65 : f32 to vector<8x32xf32>
    %494 = arith.addf %493, %492 : vector<8x32xf32>
    %495 = arith.divf %493, %494 : vector<8x32xf32>
    %496 = vector.extract_strided_slice %458 {offsets = [0, 64], sizes = [8, 32], strides = [1, 1]} : vector<8x128xf32> to vector<8x32xf32>
    %497 = math.tanh %496 : vector<8x32xf32>
    %498 = vector.extract_strided_slice %458 {offsets = [0, 96], sizes = [8, 32], strides = [1, 1]} : vector<8x128xf32> to vector<8x32xf32>
    %499 = arith.negf %498 : vector<8x32xf32>
    %500 = math.exp %499 : vector<8x32xf32>
    %cst_66 = arith.constant 1.000000e+00 : f32
    %501 = vector.broadcast %cst_66 : f32 to vector<8x32xf32>
    %502 = arith.addf %501, %500 : vector<8x32xf32>
    %503 = arith.divf %501, %502 : vector<8x32xf32>
    %504 = arith.mulf %495, %443 : vector<8x32xf32>
    %505 = arith.mulf %489, %497 : vector<8x32xf32>
    %506 = arith.addf %504, %505 : vector<8x32xf32>
    %507 = math.tanh %506 : vector<8x32xf32>
    %508 = arith.mulf %503, %507 : vector<8x32xf32>
    %509 = arith.maximumf %446, %483 : vector<8x32xf32>
    %510 = arith.maximumf %447, %508 : vector<8x32xf32>
    %511 = tpu.concatenate %509, %510 in 1 : vector<8x32xf32>, vector<8x32xf32> -> vector<8x64xf32>
    %c0_67 = arith.constant 0 : index
    %c0_68 = arith.constant 0 : index
    %512 = vector.load %arg4[%c0_67, %c0_68] : memref<8x64xf32, #tpu.memory_space<vmem>>, vector<8x64xf32>
    tpu.vector_store %arg4[%c0_67, %c0_68], %511 {strides = array<i32>} : memref<8x64xf32, #tpu.memory_space<vmem>>, vector<8x64xf32>,
    return
  }
}

</mosaic_0001>

<bundles_post_ra>
// kernel: _encode_fn.1
= control target key start
LH: loop header
LB: loop body
LE: loop exit
PB: predicated region body
PF: predicated region fallthrough
CT: control target
= control target key end

     0   :  { %v1195_v1 = vmov 0   ;;  %vm74_vm0 = vcmask 261120   ;;  %v44_v17 = vlaneseq  ;;  %vm260_vm1 = vcmask 523264   ;;  %s1556_s1 = inlined_call_operand.vmem [shape: bf16[32,256], index: 1, kind: input, shape index: {}]   ;;  %s1557_s0 = inlined_call_operand.vmem [shape: f32[8,8,32], index: 0, kind: input, shape index: {}]   ;;  %s1558_s3 = inlined_call_operand.vmem [shape: f32[1,256], index: 3, kind: input, shape index: {}]   ;;  %s1559_s2 = inlined_call_operand.vmem [shape: bf16[64,256], index: 2, kind: input, shape index: {}]   ;;  %s1560_s4 = inlined_call_operand.vmem [shape: f32[8,64], index: 4, kind: output, shape index: {}]  }
   0x1   :  { %v1049_v0 = vld [vmem:[%s1556_s1 + $0x4] ss:$8 sps:$4 sm:$0xff]   ;;  %119 = vmatprep.mubr.bf16.mxu0 %v1195_v1  ;;  %296 = vmatprep.mubr.bf16.mxu1 %v1195_v1  ;;  %v1051_v2 = vld [vmem:[%s1556_s1] ss:$8 sps:$4 sm:$0xff]   ;;  %v1052_v3 = vld [vmem:[%s1556_s1 + $0x14] ss:$8 sps:$4 sm:$0xff]  }
   0x2   :  { %87 = vmatprep.subr.bf16.mxu0 %v1049_v0  ;;  %v1054_v4 = vld [vmem:[%s1556_s1 + $0x10] ss:$8 sps:$4 sm:$0xff]   ;;  %v31_v5 = vld [vmem:[%s1557_s0] sm:$0xff]  ;;  %v32_v6 = vld [vmem:[%s1557_s0 + $0x8] sm:$0xff]  ;;  %v45_v18 = vshrl.u32 %v44_v17, 7 }
   0x3   :  { %88 = vmatpush1.bf16.msra.mxu0 %v1051_v2  ;;  %v39_v7 = vpack.c.bf16 %v32_v6, %v31_v5  ;;  %v33_v8 = vld [vmem:[%s1557_s0 + $0x10] sm:$0xff]  ;;  %v34_v9 = vld [vmem:[%s1557_s0 + $0x18] sm:$0xff]  ;;  %v35_v11 = vld [vmem:[%s1557_s0 + $0x20] sm:$0xff] }
   0x4   :  { %89 = vmatprep.subr.bf16.mxu0 %v1052_v3  ;;  %v40_v10 = vpack.c.bf16 %v34_v9, %v33_v8  ;;  %v36_v12 = vld [vmem:[%s1557_s0 + $0x28] sm:$0xff]  ;;  %v37_v14 = vld [vmem:[%s1557_s0 + $0x30] sm:$0xff]  ;;  %v38_v15 = vld [vmem:[%s1557_s0 + $0x38] sm:$0xff]  ;;  %v46_v19 = vsub.s32 0, %v45_v18  ;;  %v50_v21 = vsub.s32 1, %v45_v18  ;;  %s1196_s0 = smov 64  }
   0x5   :  { %v41_v13 = vpack.c.bf16 %v36_v12, %v35_v11  ;;  %v42_v16 = vpack.c.bf16 %v38_v15, %v37_v14  ;;  %v30_v20 = vld [vmem:[%s1558_s3] sm:$0x3]  ;;  %s1197_s3 = smov 32   ;;  %v1315_v15 = vld [vmem:[%s1559_s2 + $0x4] ss:$8 sps:$4 sm:$0xff]  }
   0x6   :  { %v47_v22 = vrot.slane %v30_v20, %v46_v19  ;;  %v51_v23 = vrot.slane %v30_v20, %v50_v21  ;;  %264 = vmatprep.subr.bf16.mxu1 %v1315_v15  ;;  %v1326_v17 = vld [vmem:[%s1559_s2 + $0x14] ss:$8 sps:$4 sm:$0xff]   ;;  %v1333_v18 = vld [vmem:[%s1559_s2 + $0x10] ss:$8 sps:$4 sm:$0xff]   ;;  %v1340_v19 = vld [vmem:[%s1559_s2 + $0x24] ss:$8 sps:$4 sm:$0xff]  }
   0x7   :  { %90 = vmatpush1.bf16.msra.mxu0 %v1054_v4  ;;  %v1347_v20 = vld [vmem:[%s1559_s2 + $0x20] ss:$8 sps:$4 sm:$0xff]   ;;  %v1354_v21 = vld [vmem:[%s1559_s2 + $0x34] ss:$8 sps:$4 sm:$0xff]  }
   0x8   :  { %476 = vmatprep.subr.bf16.mxu0 %v1315_v15 }
   0xa   :  { %1011 = vmatmul.mubr.msk.bf16.vlgmr.msra.gmra.mrb[0].mxu0 %vm74_vm0, %v39_v7 }
   0xb   :  { %129 = vmatprep.mubr.bf16.mxu0 %v1195_v1 }
  0x12   :  { %1012 = vmatmul.mubr.msk.bf16.gmra.mrb[4].mxu0 %vm74_vm0, %v40_v10 }
  0x13   :  { %139 = vmatprep.mubr.bf16.mxu0 %v1195_v1 }
  0x1a   :  { %1013 = vmatmul.mubr.msk.bf16.gmra.mrb[8].mxu0 %vm74_vm0, %v41_v13 }
  0x1b   :  { %149 = vmatprep.mubr.bf16.mxu0 %v1195_v1 }
  0x22   :  { %1014 = vmatmul.mubr.msk.bf16.gmra.mrb[12].mxu0 %vm74_vm0, %v42_v16  ;;  %v1320_v16 = vld [vmem:[%s1559_s2] ss:$8 sps:$4 sm:$0xff]  }
  0x23   :  { %508 = vmatprep.mubr.bf16.mxu0 %v1195_v1  ;;  %265 = vmatpush1.bf16.msra.mxu1 %v1320_v16 }
  0x24   :  { %477 = vmatpush1.bf16.msra.mxu0 %v1320_v16  ;;  %266 = vmatprep.subr.bf16.mxu1 %v1326_v17 }
  0x25   :  { %478 = vmatprep.subr.bf16.mxu0 %v1326_v17 }
  0x27   :  { %267 = vmatpush1.bf16.msra.mxu1 %v1333_v18 }
  0x28   :  { %479 = vmatpush1.bf16.msra.mxu0 %v1333_v18  ;;  %268 = vmatprep.subr.bf16.mxu1 %v1340_v19 }
  0x29   :  { %480 = vmatprep.subr.bf16.mxu0 %v1340_v19 }
  0x2b   :  { %269 = vmatpush1.bf16.msra.mxu1 %v1347_v20 }
  0x2c   :  { %481 = vmatpush1.bf16.msra.mxu0 %v1347_v20  ;;  %270 = vmatprep.subr.bf16.mxu1 %v1354_v21 }
  0x2d   :  { %482 = vmatprep.subr.bf16.mxu0 %v1354_v21 }
  0xdd   :  { %v121_v24 = vpop.f32.mrb[0].mxu0 }
  0xde   :  { %v122_v25 = vadd.f32 %v121_v24, %v47_v22  ;;  %v123_v26 = vpop.f32.mrb[1].mxu0  ;;  %v1368_v24 = vld [vmem:[%s1559_s2 + $0x30] ss:$8 sps:$4 sm:$0xff]  }
  0xdf   :  { %v1272_v27 = vadd.f32 %v123_v26, %v51_v23  ;;  %v125_v28 = vpop.f32.mrb[2].mxu0  ;;  %271 = vmatpush1.bf16.msra.mxu1 %v1368_v24  ;;  %483 = vmatpush1.bf16.msra.mxu0 %v1368_v24 }
  0xe0   :  { %1067 = vtanh.f32 %v122_v25  ;;  %v1274_v29 = vadd.f32 %v125_v28, %v47_v22  ;;  %v127_v30 = vpop.f32.mrb[3].mxu0  ;;  %v1015_v58 = vmul.f32 -1.442695, %v122_v25  ;;  %370 = vmatprep.subr.bf16.mxu1 %v1315_v15  ;;  %688 = vmatprep.subr.bf16.mxu0 %v1315_v15 }
  0xe1   :  { %v1276_v31 = vadd.f32 %v127_v30, %v51_v23 }
  0xe5   :  { %v131_v32 = vpop.f32.mrb[4].mxu0 }
  0xe6   :  { %v1278_v33 = vadd.f32 %v131_v32, %v47_v22  ;;  %v133_v34 = vpop.f32.mrb[5].mxu0 }
  0xe7   :  { %v1280_v35 = vadd.f32 %v133_v34, %v51_v23  ;;  %v135_v36 = vpop.f32.mrb[6].mxu0 }
  0xe8   :  { %v1282_v37 = vadd.f32 %v135_v36, %v47_v22  ;;  %v137_v38 = vpop.f32.mrb[7].mxu0 }
  0xe9   :  { %v1284_v39 = vadd.f32 %v137_v38, %v51_v23 }
  0xea   :  { %v1068_v40 = vpop.eup %1067 }
  0xeb   :  { %171 = vrot.lane.b32.xlu0 %v1068_v40, %s1196_s0 }
  0xed   :  { %v141_v41 = vpop.f32.mrb[8].mxu0 }
  0xee   :  { %v1287_v42 = vadd.f32 %v141_v41, %v47_v22  ;;  %v143_v43 = vpop.f32.mrb[9].mxu0 }
  0xef   :  { %v1289_v44 = vadd.f32 %v143_v43, %v51_v23  ;;  %v145_v45 = vpop.f32.mrb[10].mxu0 }
  0xf0   :  { %v1291_v46 = vadd.f32 %v145_v45, %v47_v22  ;;  %v147_v47 = vpop.f32.mrb[11].mxu0 }
  0xf1   :  { %v1293_v48 = vadd.f32 %v147_v47, %v51_v23 }
  0xf5   :  { %v151_v49 = vpop.f32.mrb[12].mxu0 }
  0xf6   :  { %v1295_v50 = vadd.f32 %v151_v49, %v47_v22  ;;  %v153_v51 = vpop.f32.mrb[13].mxu0 }
  0xf7   :  { %v1297_v52 = vadd.f32 %v153_v51, %v51_v23  ;;  %v155_v53 = vpop.f32.mrb[14].mxu0 }
  0xf8   :  { %v1299_v54 = vadd.f32 %v155_v53, %v47_v22  ;;  %v157_v55 = vpop.f32.mrb[15].mxu0 }
  0xf9   :  { %v158_v56 = vadd.f32 %v157_v55, %v51_v23 }
  0xfb   :  { %1069 = vtanh.f32 %v158_v56  ;;  %v1016_v61 = vmul.f32 -1.442695, %v158_v56 }
  0xfc   :  { %1071 = vpow2.f32 %v1015_v58 }
 0x105   :  { %v1070_v57 = vpop.eup %1069 }
 0x106   :  { %195 = vrot.lane.b32.xlu0 %v1070_v57, %s1196_s0  ;;  %v1072_v59 = vpop.eup %1071 }
 0x107   :  { %v165_v60 = vadd.f32 1.0, %v1072_v59 }
 0x109   :  { %1073 = vrcp.f32 %v165_v60 }
 0x10a   :  { %1075 = vpow2.f32 %v1016_v61 }
 0x113   :  { %v1074_v62 = vpop.eup %1073 }
 0x114   :  { %v1076_v2 = vpop.eup %1075  ;;  %v169_v7 = vmul.f32 0.0, %v1074_v62 }
 0x115   :  { %v189_v3 = vadd.f32 1.0, %v1076_v2 }
 0x117   :  { %1077 = vrcp.f32 %v189_v3 }
 0x121   :  { %v1078_v4 = vpop.eup %1077 }
 0x122   :  { %v193_v11 = vmul.f32 0.0, %v1078_v4 }
 0x15d   :  { %v172_v63 = vpop.permute.xlu0 %171 }
 0x15e   :  { %v174_v0 = vmul.f32 %v1074_v62, %v172_v63 }
 0x160   :  { %176 = vrot.lane.b32.xlu1 %v174_v0, %s1197_s3 }
 0x178   :  { %v196_v5 = vpop.permute.xlu0 %195 }
 0x179   :  { %v198_v6 = vmul.f32 %v1078_v4, %v196_v5 }
 0x17b   :  { %200 = vrot.lane.b32.xlu1 %v198_v6, %s1197_s3 }
 0x1d2   :  { %v177_v8 = vpop.permute.xlu1 %176 }
 0x1d3   :  { %v1304_v9 = vadd.f32 %v177_v8, %v169_v7 }
 0x1d5   :  { %1079 = vtanh.f32 %v1304_v9 }
 0x1df   :  { %v1080_v10 = vpop.eup %1079 }
 0x1e0   :  { %182 = vrot.lane.b32.xlu0 %v1080_v10, %s1196_s0 }
 0x1ed   :  { %v201_v12 = vpop.permute.xlu1 %200 }
 0x1ee   :  { %v1308_v13 = vadd.f32 %v201_v12, %v193_v11 }
 0x1f0   :  { %1081 = vtanh.f32 %v1308_v13 }
 0x1fa   :  { %v1082_v14 = vpop.eup %1081 }
 0x1fb   :  { %206 = vrot.lane.b32.xlu1 %v1082_v14, %s1196_s0 }
 0x252   :  { %v183_v22 = vpop.permute.xlu0 %182 }
 0x253   :  { %v1357_v23 = vmul.f32 %v1074_v62, %v183_v22 }
 0x255   :  { %211 = vrot.lane.b32.xlu0 %v1357_v23, %s1197_s3 }
 0x26d   :  { %v207_v25 = vpop.permute.xlu1 %206 }
 0x26e   :  { %v1374_v26 = vmul.f32 %v1078_v4, %v207_v25 }
 0x270   :  { %215 = vrot.lane.b32.xlu1 %v1374_v26, %s1196_s0 }
 0x2c7   :  { %v212_v28 = vpop.permute.xlu0 %211 }
 0x2e2   :  { %v216_v30 = vpop.permute.xlu1 %215 }
 0x2e3   :  { %v218_v32 = vsel %vm74_vm0, %v212_v28, %v216_v30 }
 0x2e4   :  { %v219_v34 = vpack.c.bf16 %v218_v32, %v218_v32 }
 0x2e6   :  { %1025 = vmatmul.mubr.msk.bf16.vlgmr.msra.gmra.mrb[0].mxu1 %vm260_vm1, %v219_v34 }
 0x2e7   :  { %371 = vmatpush1.bf16.msra.mxu1 %v1320_v16  ;;  %402 = vmatprep.mubr.bf16.mxu1 %v1195_v1 }
 0x2e8   :  { %372 = vmatprep.subr.bf16.mxu1 %v1326_v17 }
 0x2eb   :  { %373 = vmatpush1.bf16.msra.mxu1 %v1333_v18 }
 0x2ec   :  { %374 = vmatprep.subr.bf16.mxu1 %v1340_v19 }
 0x2ef   :  { %375 = vmatpush1.bf16.msra.mxu1 %v1347_v20 }
 0x2f0   :  { %376 = vmatprep.subr.bf16.mxu1 %v1354_v21 }
 0x2f3   :  { %377 = vmatpush1.bf16.msra.mxu1 %v1368_v24 }
 0x2f4   :  { %582 = vmatprep.subr.bf16.mxu1 %v1315_v15 }
 0x3b9   :  { %v298_v36 = vpop.f32.mrb[0].mxu1 }
 0x3ba   :  { %v305_v38 = vadd.f32 %v298_v36, %v1274_v29  ;;  %v300_v40 = vpop.f32.mrb[1].mxu1 }
 0x3bb   :  { %v306_v41 = vadd.f32 %v300_v40, %v1297_v52  ;;  %v302_v43 = vpop.f32.mrb[2].mxu1 }
 0x3bc   :  { %1083 = vtanh.f32 %v305_v38  ;;  %v303_v45 = vpop.f32.mrb[3].mxu1  ;;  %v1026_v51 = vmul.f32 -1.442695, %v305_v38 }
 0x3bd   :  { %1085 = vtanh.f32 %v306_v41  ;;  %v1027_v53 = vmul.f32 -1.442695, %v306_v41 }
 0x3be   :  { %1087 = vpow2.f32 %v1026_v51 }
 0x3bf   :  { %1089 = vpow2.f32 %v1027_v53 }
 0x3c6   :  { %v1084_v47 = vpop.eup %1083 }
 0x3c7   :  { %v1086_v49 = vpop.eup %1085  ;;  %316 = vrot.lane.b32.xlu0 %v1084_v47, %s1196_s0 }
 0x3c8   :  { %340 = vrot.lane.b32.xlu1 %v1086_v49, %s1196_s0  ;;  %v1088_v55 = vpop.eup %1087 }
 0x3c9   :  { %v1090_v56 = vpop.eup %1089  ;;  %v310_v29 = vadd.f32 1.0, %v1088_v55 }
 0x3ca   :  { %v334_v57 = vadd.f32 1.0, %v1090_v56 }
 0x3cb   :  { %1091 = vrcp.f32 %v310_v29 }
 0x3cc   :  { %1093 = vrcp.f32 %v334_v57 }
 0x3d5   :  { %v1092_v52 = vpop.eup %1091 }
 0x3d6   :  { %v1094_v59 = vpop.eup %1093  ;;  %v314_v63 = vmul.f32 %v1092_v52, %v1304_v9 }
 0x3d7   :  { %v338_v2 = vmul.f32 %v1094_v59, %v1308_v13 }
 0x439   :  { %v317_v58 = vpop.permute.xlu0 %316 }
 0x43a   :  { %v319_v60 = vmul.f32 %v1092_v52, %v317_v58  ;;  %v341_v61 = vpop.permute.xlu1 %340 }
 0x43b   :  { %v343_v62 = vmul.f32 %v1094_v59, %v341_v61 }
 0x43c   :  { %321 = vrot.lane.b32.xlu0 %v319_v60, %s1197_s3 }
 0x43d   :  { %345 = vrot.lane.b32.xlu1 %v343_v62, %s1197_s3 }
 0x4ae   :  { %v322_v0 = vpop.permute.xlu0 %321 }
 0x4af   :  { %v324_v3 = vadd.f32 %v322_v0, %v314_v63  ;;  %v346_v4 = vpop.permute.xlu1 %345 }
 0x4b0   :  { %v348_v5 = vadd.f32 %v346_v4, %v338_v2 }
 0x4b1   :  { %1095 = vtanh.f32 %v324_v3 }
 0x4b2   :  { %1097 = vtanh.f32 %v348_v5 }
 0x4bb   :  { %v1096_v6 = vpop.eup %1095 }
 0x4bc   :  { %v1098_v7 = vpop.eup %1097  ;;  %327 = vrot.lane.b32.xlu0 %v1096_v6, %s1196_s0 }
 0x4bd   :  { %351 = vrot.lane.b32.xlu1 %v1098_v7, %s1196_s0 }
 0x52e   :  { %v328_v8 = vpop.permute.xlu0 %327 }
 0x52f   :  { %v1399_v10 = vmul.f32 %v1092_v52, %v328_v8  ;;  %v352_v11 = vpop.permute.xlu1 %351 }
 0x530   :  { %v1401_v12 = vmul.f32 %v1094_v59, %v352_v11 }
 0x531   :  { %358 = vrot.lane.b32.xlu0 %v1399_v10, %s1197_s3  ;;  %v355_v2 = vmax.f32 %v1357_v23, %v1399_v10 }
 0x532   :  { %362 = vrot.lane.b32.xlu1 %v1401_v12, %s1196_s0 }
 0x5a3   :  { %v359_v9 = vpop.permute.xlu0 %358 }
 0x5a4   :  { %v363_v13 = vpop.permute.xlu1 %362 }
 0x5a5   :  { %v365_v14 = vsel %vm74_vm0, %v359_v9, %v363_v13 }
 0x5a6   :  { %v366_v22 = vpack.c.bf16 %v365_v14, %v365_v14 }
 0x5a8   :  { %1028 = vmatmul.mubr.msk.bf16.vlgmr.msra.gmra.mrb[4].mxu1 %vm260_vm1, %v366_v22 }
 0x5a9   :  { %583 = vmatpush1.bf16.msra.mxu1 %v1320_v16  ;;  %614 = vmatprep.mubr.bf16.mxu1 %v1195_v1 }
 0x5aa   :  { %584 = vmatprep.subr.bf16.mxu1 %v1326_v17 }
 0x5ad   :  { %585 = vmatpush1.bf16.msra.mxu1 %v1333_v18 }
 0x5ae   :  { %586 = vmatprep.subr.bf16.mxu1 %v1340_v19 }
 0x5b1   :  { %587 = vmatpush1.bf16.msra.mxu1 %v1347_v20 }
 0x5b2   :  { %588 = vmatprep.subr.bf16.mxu1 %v1354_v21 }
 0x5b5   :  { %589 = vmatpush1.bf16.msra.mxu1 %v1368_v24 }
 0x5b6   :  { %794 = vmatprep.subr.bf16.mxu1 %v1315_v15 }
 0x67b   :  { %v404_v25 = vpop.f32.mrb[4].mxu1 }
 0x67c   :  { %v411_v28 = vadd.f32 %v404_v25, %v1278_v33  ;;  %v406_v30 = vpop.f32.mrb[5].mxu1 }
 0x67d   :  { %v412_v32 = vadd.f32 %v406_v30, %v1293_v48  ;;  %v408_v34 = vpop.f32.mrb[6].mxu1 }
 0x67e   :  { %1099 = vtanh.f32 %v411_v28  ;;  %v409_v36 = vpop.f32.mrb[7].mxu1  ;;  %v1029_v41 = vmul.f32 -1.442695, %v411_v28 }
 0x67f   :  { %1101 = vtanh.f32 %v412_v32  ;;  %v1030_v43 = vmul.f32 -1.442695, %v412_v32 }
 0x680   :  { %1103 = vpow2.f32 %v1029_v41 }
 0x681   :  { %1105 = vpow2.f32 %v1030_v43 }
 0x688   :  { %v1100_v38 = vpop.eup %1099 }
 0x689   :  { %v1102_v40 = vpop.eup %1101  ;;  %422 = vrot.lane.b32.xlu0 %v1100_v38, %s1196_s0 }
 0x68a   :  { %446 = vrot.lane.b32.xlu1 %v1102_v40, %s1196_s0  ;;  %v1104_v45 = vpop.eup %1103 }
 0x68b   :  { %v1106_v47 = vpop.eup %1105  ;;  %v416_v33 = vadd.f32 1.0, %v1104_v45 }
 0x68c   :  { %v440_v49 = vadd.f32 1.0, %v1106_v47 }
 0x68d   :  { %1107 = vrcp.f32 %v416_v33 }
 0x68e   :  { %1109 = vrcp.f32 %v440_v49 }
 0x697   :  { %v1108_v48 = vpop.eup %1107 }
 0x698   :  { %v1110_v53 = vpop.eup %1109  ;;  %v420_v57 = vmul.f32 %v1108_v48, %v324_v3 }
 0x699   :  { %v444_v58 = vmul.f32 %v1110_v53, %v348_v5  ;;  %v356_v5 = vmax.f32 %v1374_v26, %v1401_v12 }
 0x6fb   :  { %v423_v51 = vpop.permute.xlu0 %422 }
 0x6fc   :  { %v425_v55 = vmul.f32 %v1108_v48, %v423_v51  ;;  %v447_v56 = vpop.permute.xlu1 %446 }
 0x6fd   :  { %v449_v29 = vmul.f32 %v1110_v53, %v447_v56 }
 0x6fe   :  { %427 = vrot.lane.b32.xlu0 %v425_v55, %s1197_s3 }
 0x6ff   :  { %451 = vrot.lane.b32.xlu1 %v449_v29, %s1197_s3 }
 0x770   :  { %v428_v52 = vpop.permute.xlu0 %427 }
 0x771   :  { %v1424_v59 = vadd.f32 %v428_v52, %v420_v57  ;;  %v452_v60 = vpop.permute.xlu1 %451 }
 0x772   :  { %v1426_v61 = vadd.f32 %v452_v60, %v444_v58 }
 0x773   :  { %1111 = vtanh.f32 %v1424_v59 }
 0x774   :  { %1113 = vtanh.f32 %v1426_v61 }
 0x77d   :  { %v1112_v62 = vpop.eup %1111 }
 0x77e   :  { %v1114_v63 = vpop.eup %1113  ;;  %433 = vrot.lane.b32.xlu0 %v1112_v62, %s1196_s0 }
 0x77f   :  { %457 = vrot.lane.b32.xlu1 %v1114_v63, %s1196_s0 }
 0x7f0   :  { %v434_v0 = vpop.permute.xlu0 %433 }
 0x7f1   :  { %v436_v3 = vmul.f32 %v1108_v48, %v434_v0  ;;  %v458_v4 = vpop.permute.xlu1 %457 }
 0x7f2   :  { %v460_v6 = vmul.f32 %v1110_v53, %v458_v4 }
 0x7f3   :  { %v1436_v7 = vmax.f32 %v355_v2, %v436_v3  ;;  %464 = vrot.lane.b32.xlu0 %v436_v3, %s1197_s3 }
 0x7f4   :  { %v1439_v8 = vmax.f32 %v356_v5, %v460_v6  ;;  %468 = vrot.lane.b32.xlu1 %v460_v6, %s1196_s0 }
 0x865   :  { %v465_v11 = vpop.permute.xlu0 %464 }
 0x866   :  { %v469_v9 = vpop.permute.xlu1 %468 }
 0x867   :  { %v471_v13 = vsel %vm74_vm0, %v465_v11, %v469_v9 }
 0x868   :  { %v472_v14 = vpack.c.bf16 %v471_v13, %v471_v13 }
 0x86a   :  { %1031 = vmatmul.mubr.msk.bf16.vlgmr.msra.gmra.mrb[16].mxu0 %vm260_vm1, %v472_v14 }
 0x86b   :  { %689 = vmatpush1.bf16.msra.mxu0 %v1320_v16  ;;  %720 = vmatprep.mubr.bf16.mxu0 %v1195_v1 }
 0x86c   :  { %690 = vmatprep.subr.bf16.mxu0 %v1326_v17 }
 0x86f   :  { %691 = vmatpush1.bf16.msra.mxu0 %v1333_v18 }
 0x870   :  { %692 = vmatprep.subr.bf16.mxu0 %v1340_v19 }
 0x873   :  { %693 = vmatpush1.bf16.msra.mxu0 %v1347_v20 }
 0x874   :  { %694 = vmatprep.subr.bf16.mxu0 %v1354_v21 }
 0x877   :  { %695 = vmatpush1.bf16.msra.mxu0 %v1368_v24 }
 0x878   :  { %900 = vmatprep.subr.bf16.mxu0 %v1315_v15 }
 0x93d   :  { %v510_v23 = vpop.f32.mrb[16].mxu0 }
 0x93e   :  { %v517_v26 = vadd.f32 %v510_v23, %v1282_v37  ;;  %v512_v10 = vpop.f32.mrb[17].mxu0 }
 0x93f   :  { %v518_v12 = vadd.f32 %v512_v10, %v1289_v44  ;;  %v514_v22 = vpop.f32.mrb[18].mxu0 }
 0x940   :  { %1115 = vtanh.f32 %v517_v26  ;;  %v515_v25 = vpop.f32.mrb[19].mxu0  ;;  %v1032_v32 = vmul.f32 -1.442695, %v517_v26 }
 0x941   :  { %1117 = vtanh.f32 %v518_v12  ;;  %v1033_v34 = vmul.f32 -1.442695, %v518_v12 }
 0x942   :  { %1119 = vpow2.f32 %v1032_v32 }
 0x943   :  { %1121 = vpow2.f32 %v1033_v34 }
 0x94a   :  { %v1116_v28 = vpop.eup %1115 }
 0x94b   :  { %v1118_v30 = vpop.eup %1117  ;;  %528 = vrot.lane.b32.xlu0 %v1116_v28, %s1196_s0 }
 0x94c   :  { %552 = vrot.lane.b32.xlu1 %v1118_v30, %s1196_s0  ;;  %v1120_v15 = vpop.eup %1119 }
 0x94d   :  { %v1122_v36 = vpop.eup %1121  ;;  %v522_v37 = vadd.f32 1.0, %v1120_v15 }
 0x94e   :  { %v546_v38 = vadd.f32 1.0, %v1122_v36 }
 0x94f   :  { %1123 = vrcp.f32 %v522_v37 }
 0x950   :  { %1125 = vrcp.f32 %v546_v38 }
 0x959   :  { %v1124_v44 = vpop.eup %1123 }
 0x95a   :  { %v1126_v41 = vpop.eup %1125  ;;  %v526_v33 = vmul.f32 %v1124_v44, %v1424_v59 }
 0x95b   :  { %v550_v48 = vmul.f32 %v1126_v41, %v1426_v61 }
 0x9bd   :  { %v529_v40 = vpop.permute.xlu0 %528 }
 0x9be   :  { %v531_v43 = vmul.f32 %v1124_v44, %v529_v40  ;;  %v553_v45 = vpop.permute.xlu1 %552 }
 0x9bf   :  { %v555_v47 = vmul.f32 %v1126_v41, %v553_v45 }
 0x9c0   :  { %533 = vrot.lane.b32.xlu0 %v531_v43, %s1197_s3 }
 0x9c1   :  { %557 = vrot.lane.b32.xlu1 %v555_v47, %s1197_s3 }
 0xa32   :  { %v534_v49 = vpop.permute.xlu0 %533 }
 0xa33   :  { %v536_v51 = vadd.f32 %v534_v49, %v526_v33  ;;  %v558_v53 = vpop.permute.xlu1 %557 }
 0xa34   :  { %v560_v55 = vadd.f32 %v558_v53, %v550_v48 }
 0xa35   :  { %1127 = vtanh.f32 %v536_v51 }
 0xa36   :  { %1129 = vtanh.f32 %v560_v55 }
 0xa3f   :  { %v1128_v56 = vpop.eup %1127 }
 0xa40   :  { %v1130_v29 = vpop.eup %1129  ;;  %539 = vrot.lane.b32.xlu0 %v1128_v56, %s1196_s0 }
 0xa41   :  { %563 = vrot.lane.b32.xlu1 %v1130_v29, %s1196_s0 }
 0xab2   :  { %v540_v57 = vpop.permute.xlu0 %539 }
 0xab3   :  { %v1463_v52 = vmul.f32 %v1124_v44, %v540_v57  ;;  %v564_v58 = vpop.permute.xlu1 %563 }
 0xab4   :  { %v1465_v60 = vmul.f32 %v1126_v41, %v564_v58 }
 0xab5   :  { %v567_v59 = vmax.f32 %v1436_v7, %v1463_v52  ;;  %570 = vrot.lane.b32.xlu0 %v1463_v52, %s1197_s3 }
 0xab6   :  { %v568_v61 = vmax.f32 %v1439_v8, %v1465_v60  ;;  %574 = vrot.lane.b32.xlu1 %v1465_v60, %s1196_s0 }
 0xb27   :  { %v571_v62 = vpop.permute.xlu0 %570 }
 0xb28   :  { %v575_v63 = vpop.permute.xlu1 %574 }
 0xb29   :  { %v577_v0 = vsel %vm74_vm0, %v571_v62, %v575_v63 }
 0xb2a   :  { %v578_v2 = vpack.c.bf16 %v577_v0, %v577_v0 }
 0xb2c   :  { %1034 = vmatmul.mubr.msk.bf16.vlgmr.msra.gmra.mrb[8].mxu1 %vm260_vm1, %v578_v2 }
 0xb2d   :  { %795 = vmatpush1.bf16.msra.mxu1 %v1320_v16  ;;  %826 = vmatprep.mubr.bf16.mxu1 %v1195_v1 }
 0xb2e   :  { %796 = vmatprep.subr.bf16.mxu1 %v1326_v17 }
 0xb31   :  { %797 = vmatpush1.bf16.msra.mxu1 %v1333_v18 }
 0xb32   :  { %798 = vmatprep.subr.bf16.mxu1 %v1340_v19 }
 0xb35   :  { %799 = vmatpush1.bf16.msra.mxu1 %v1347_v20 }
 0xb36   :  { %800 = vmatprep.subr.bf16.mxu1 %v1354_v21 }
 0xb39   :  { %801 = vmatpush1.bf16.msra.mxu1 %v1368_v24 }
 0xbff   :  { %v616_v3 = vpop.f32.mrb[8].mxu1 }
 0xc00   :  { %v623_v4 = vadd.f32 %v616_v3, %v1287_v42  ;;  %v618_v5 = vpop.f32.mrb[9].mxu1 }
 0xc01   :  { %v624_v6 = vadd.f32 %v618_v5, %v1284_v39  ;;  %v620_v11 = vpop.f32.mrb[10].mxu1 }
 0xc02   :  { %1131 = vtanh.f32 %v623_v4  ;;  %v621_v9 = vpop.f32.mrb[11].mxu1  ;;  %v1035_v23 = vmul.f32 -1.442695, %v623_v4 }
 0xc03   :  { %1133 = vtanh.f32 %v624_v6  ;;  %v1036_v26 = vmul.f32 -1.442695, %v624_v6 }
 0xc04   :  { %1135 = vpow2.f32 %v1035_v23 }
 0xc05   :  { %1137 = vpow2.f32 %v1036_v26 }
 0xc0c   :  { %v1132_v13 = vpop.eup %1131 }
 0xc0d   :  { %v1134_v14 = vpop.eup %1133  ;;  %634 = vrot.lane.b32.xlu0 %v1132_v13, %s1196_s0 }
 0xc0e   :  { %658 = vrot.lane.b32.xlu1 %v1134_v14, %s1196_s0  ;;  %v1136_v10 = vpop.eup %1135 }
 0xc0f   :  { %v1138_v12 = vpop.eup %1137  ;;  %v628_v42 = vadd.f32 1.0, %v1136_v10 }
 0xc10   :  { %v652_v22 = vadd.f32 1.0, %v1138_v12 }
 0xc11   :  { %1139 = vrcp.f32 %v628_v42 }
 0xc12   :  { %1141 = vrcp.f32 %v652_v22 }
 0xc1b   :  { %v1140_v39 = vpop.eup %1139 }
 0xc1c   :  { %v1142_v28 = vpop.eup %1141  ;;  %v632_v15 = vmul.f32 %v1140_v39, %v536_v51 }
 0xc1d   :  { %v656_v37 = vmul.f32 %v1142_v28, %v560_v55 }
 0xc7f   :  { %v635_v25 = vpop.permute.xlu0 %634 }
 0xc80   :  { %v637_v30 = vmul.f32 %v1140_v39, %v635_v25  ;;  %v659_v32 = vpop.permute.xlu1 %658 }
 0xc81   :  { %v661_v34 = vmul.f32 %v1142_v28, %v659_v32 }
 0xc82   :  { %639 = vrot.lane.b32.xlu0 %v637_v30, %s1197_s3 }
 0xc83   :  { %663 = vrot.lane.b32.xlu1 %v661_v34, %s1197_s3 }
 0xcf4   :  { %v640_v36 = vpop.permute.xlu0 %639 }
 0xcf5   :  { %v642_v38 = vadd.f32 %v640_v36, %v632_v15  ;;  %v664_v44 = vpop.permute.xlu1 %663 }
 0xcf6   :  { %v666_v40 = vadd.f32 %v664_v44, %v656_v37 }
 0xcf7   :  { %1143 = vtanh.f32 %v642_v38 }
 0xcf8   :  { %1145 = vtanh.f32 %v666_v40 }
 0xd01   :  { %v1144_v41 = vpop.eup %1143 }
 0xd02   :  { %v1146_v43 = vpop.eup %1145  ;;  %645 = vrot.lane.b32.xlu0 %v1144_v41, %s1196_s0 }
 0xd03   :  { %669 = vrot.lane.b32.xlu1 %v1146_v43, %s1196_s0 }
 0xd74   :  { %v646_v45 = vpop.permute.xlu0 %645 }
 0xd75   :  { %v648_v47 = vmul.f32 %v1140_v39, %v646_v45  ;;  %v670_v33 = vpop.permute.xlu1 %669 }
 0xd76   :  { %v672_v49 = vmul.f32 %v1142_v28, %v670_v33 }
 0xd77   :  { %v1496_v48 = vmax.f32 %v567_v59, %v648_v47  ;;  %676 = vrot.lane.b32.xlu0 %v648_v47, %s1197_s3 }
 0xd78   :  { %v1502_v51 = vmax.f32 %v568_v61, %v672_v49  ;;  %680 = vrot.lane.b32.xlu1 %v672_v49, %s1196_s0 }
 0xde9   :  { %v677_v53 = vpop.permute.xlu0 %676 }
 0xdea   :  { %v681_v55 = vpop.permute.xlu1 %680 }
 0xdeb   :  { %v683_v56 = vsel %vm74_vm0, %v677_v53, %v681_v55 }
 0xdec   :  { %v684_v29 = vpack.c.bf16 %v683_v56, %v683_v56 }
 0xdee   :  { %1037 = vmatmul.mubr.msk.bf16.vlgmr.msra.gmra.mrb[20].mxu0 %vm260_vm1, %v684_v29 }
 0xdef   :  { %901 = vmatpush1.bf16.msra.mxu0 %v1320_v16  ;;  %932 = vmatprep.mubr.bf16.mxu0 %v1195_v1 }
 0xdf0   :  { %902 = vmatprep.subr.bf16.mxu0 %v1326_v17 }
 0xdf3   :  { %903 = vmatpush1.bf16.msra.mxu0 %v1333_v18 }
 0xdf4   :  { %904 = vmatprep.subr.bf16.mxu0 %v1340_v19 }
 0xdf7   :  { %905 = vmatpush1.bf16.msra.mxu0 %v1347_v20 }
 0xdf8   :  { %906 = vmatprep.subr.bf16.mxu0 %v1354_v21 }
 0xdfb   :  { %907 = vmatpush1.bf16.msra.mxu0 %v1368_v24 }
 0xec1   :  { %v722_v7 = vpop.f32.mrb[20].mxu0 }
 0xec2   :  { %v729_v8 = vadd.f32 %v722_v7, %v1291_v46  ;;  %v724_v57 = vpop.f32.mrb[21].mxu0 }
 0xec3   :  { %v730_v16 = vadd.f32 %v724_v57, %v1280_v35  ;;  %v726_v52 = vpop.f32.mrb[22].mxu0 }
 0xec4   :  { %1147 = vtanh.f32 %v729_v8  ;;  %v727_v1 = vpop.f32.mrb[23].mxu0  ;;  %v1038_v19 = vmul.f32 -1.442695, %v729_v8 }
 0xec5   :  { %1149 = vtanh.f32 %v730_v16  ;;  %v1039_v20 = vmul.f32 -1.442695, %v730_v16 }
 0xec6   :  { %1151 = vpow2.f32 %v1038_v19 }
 0xec7   :  { %1153 = vpow2.f32 %v1039_v20 }
 0xece   :  { %v1148_v17 = vpop.eup %1147 }
 0xecf   :  { %v1150_v18 = vpop.eup %1149  ;;  %740 = vrot.lane.b32.xlu0 %v1148_v17, %s1196_s0 }
 0xed0   :  { %764 = vrot.lane.b32.xlu1 %v1150_v18, %s1196_s0  ;;  %v1152_v21 = vpop.eup %1151 }
 0xed1   :  { %v1154_v24 = vpop.eup %1153  ;;  %v734_v46 = vadd.f32 1.0, %v1152_v21 }
 0xed2   :  { %v758_v58 = vadd.f32 1.0, %v1154_v24 }
 0xed3   :  { %1155 = vrcp.f32 %v734_v46 }
 0xed4   :  { %1157 = vrcp.f32 %v758_v58 }
 0xedd   :  { %v1156_v35 = vpop.eup %1155 }
 0xede   :  { %v1158_v59 = vpop.eup %1157  ;;  %v738_v0 = vmul.f32 %v1156_v35, %v642_v38 }
 0xedf   :  { %v762_v3 = vmul.f32 %v1158_v59, %v666_v40 }
 0xf41   :  { %v741_v60 = vpop.permute.xlu0 %740 }
 0xf42   :  { %v743_v61 = vmul.f32 %v1156_v35, %v741_v60  ;;  %v765_v62 = vpop.permute.xlu1 %764 }
 0xf43   :  { %v767_v63 = vmul.f32 %v1158_v59, %v765_v62 }
 0xf44   :  { %745 = vrot.lane.b32.xlu0 %v743_v61, %s1197_s3 }
 0xf45   :  { %769 = vrot.lane.b32.xlu1 %v767_v63, %s1197_s3 }
 0xfb6   :  { %v746_v2 = vpop.permute.xlu0 %745 }
 0xfb7   :  { %v748_v4 = vadd.f32 %v746_v2, %v738_v0  ;;  %v770_v5 = vpop.permute.xlu1 %769 }
 0xfb8   :  { %v772_v6 = vadd.f32 %v770_v5, %v762_v3 }
 0xfb9   :  { %1159 = vtanh.f32 %v748_v4 }
 0xfba   :  { %1161 = vtanh.f32 %v772_v6 }
 0xfc3   :  { %v1160_v11 = vpop.eup %1159 }
 0xfc4   :  { %v1162_v9 = vpop.eup %1161  ;;  %751 = vrot.lane.b32.xlu0 %v1160_v11, %s1196_s0 }
 0xfc5   :  { %775 = vrot.lane.b32.xlu1 %v1162_v9, %s1196_s0 }
0x1036   :  { %v752_v13 = vpop.permute.xlu0 %751 }
0x1037   :  { %v754_v14 = vmul.f32 %v1156_v35, %v752_v13  ;;  %v776_v23 = vpop.permute.xlu1 %775 }
0x1038   :  { %v778_v26 = vmul.f32 %v1158_v59, %v776_v23 }
0x1039   :  { %v779_v10 = vmax.f32 %v1496_v48, %v754_v14  ;;  %782 = vrot.lane.b32.xlu0 %v754_v14, %s1197_s3 }
0x103a   :  { %v780_v12 = vmax.f32 %v1502_v51, %v778_v26  ;;  %786 = vrot.lane.b32.xlu1 %v778_v26, %s1196_s0 }
0x10ab   :  { %v783_v42 = vpop.permute.xlu0 %782 }
0x10ac   :  { %v787_v22 = vpop.permute.xlu1 %786 }
0x10ad   :  { %v789_v39 = vsel %vm74_vm0, %v783_v42, %v787_v22 }
0x10ae   :  { %v790_v25 = vpack.c.bf16 %v789_v39, %v789_v39 }
0x10b0   :  { %1040 = vmatmul.mubr.msk.bf16.vlgmr.msra.gmra.mrb[12].mxu1 %vm260_vm1, %v790_v25 }
0x1183   :  { %v828_v28 = vpop.f32.mrb[12].mxu1 }
0x1184   :  { %v835_v30 = vadd.f32 %v828_v28, %v1295_v50  ;;  %v830_v32 = vpop.f32.mrb[13].mxu1 }
0x1185   :  { %v836_v34 = vadd.f32 %v830_v32, %v1276_v31  ;;  %v832_v15 = vpop.f32.mrb[14].mxu1 }
0x1186   :  { %1163 = vtanh.f32 %v835_v30  ;;  %v833_v36 = vpop.f32.mrb[15].mxu1  ;;  %v1041_v44 = vmul.f32 -1.442695, %v835_v30 }
0x1187   :  { %1165 = vtanh.f32 %v836_v34  ;;  %v1042_v40 = vmul.f32 -1.442695, %v836_v34 }
0x1188   :  { %1167 = vpow2.f32 %v1041_v44 }
0x1189   :  { %1169 = vpow2.f32 %v1042_v40 }
0x1190   :  { %v1164_v37 = vpop.eup %1163 }
0x1191   :  { %v1166_v38 = vpop.eup %1165  ;;  %846 = vrot.lane.b32.xlu0 %v1164_v37, %s1196_s0 }
0x1192   :  { %870 = vrot.lane.b32.xlu1 %v1166_v38, %s1196_s0  ;;  %v1168_v41 = vpop.eup %1167 }
0x1193   :  { %v1170_v43 = vpop.eup %1169  ;;  %v840_v50 = vadd.f32 1.0, %v1168_v41 }
0x1194   :  { %v864_v45 = vadd.f32 1.0, %v1170_v43 }
0x1195   :  { %1171 = vrcp.f32 %v840_v50 }
0x1196   :  { %1173 = vrcp.f32 %v864_v45 }
0x119f   :  { %v1172_v31 = vpop.eup %1171 }
0x11a0   :  { %v1174_v33 = vpop.eup %1173  ;;  %v844_v53 = vmul.f32 %v1172_v31, %v748_v4 }
0x11a1   :  { %v868_v56 = vmul.f32 %v1174_v33, %v772_v6 }
0x1203   :  { %v847_v47 = vpop.permute.xlu0 %846 }
0x1204   :  { %v849_v49 = vmul.f32 %v1172_v31, %v847_v47  ;;  %v871_v48 = vpop.permute.xlu1 %870 }
0x1205   :  { %v873_v51 = vmul.f32 %v1174_v33, %v871_v48 }
0x1206   :  { %851 = vrot.lane.b32.xlu0 %v849_v49, %s1197_s3 }
0x1207   :  { %875 = vrot.lane.b32.xlu1 %v873_v51, %s1197_s3 }
0x1278   :  { %v852_v55 = vpop.permute.xlu0 %851 }
0x1279   :  { %v854_v29 = vadd.f32 %v852_v55, %v844_v53  ;;  %v876_v7 = vpop.permute.xlu1 %875 }
0x127a   :  { %v878_v8 = vadd.f32 %v876_v7, %v868_v56 }
0x127b   :  { %1175 = vtanh.f32 %v854_v29 }
0x127c   :  { %1177 = vtanh.f32 %v878_v8 }
0x1285   :  { %v1176_v57 = vpop.eup %1175 }
0x1286   :  { %v1178_v16 = vpop.eup %1177  ;;  %857 = vrot.lane.b32.xlu0 %v1176_v57, %s1196_s0 }
0x1287   :  { %881 = vrot.lane.b32.xlu1 %v1178_v16, %s1196_s0 }
0x12f8   :  { %v858_v52 = vpop.permute.xlu0 %857 }
0x12f9   :  { %v860_v1 = vmul.f32 %v1172_v31, %v858_v52  ;;  %v882_v17 = vpop.permute.xlu1 %881 }
0x12fa   :  { %v884_v18 = vmul.f32 %v1174_v33, %v882_v17 }
0x12fb   :  { %v885_v19 = vmax.f32 %v779_v10, %v860_v1  ;;  %888 = vrot.lane.b32.xlu0 %v860_v1, %s1197_s3 }
0x12fc   :  { %v886_v20 = vmax.f32 %v780_v12, %v884_v18  ;;  %892 = vrot.lane.b32.xlu1 %v884_v18, %s1196_s0 }
0x136d   :  { %v889_v21 = vpop.permute.xlu0 %888 }
0x136e   :  { %v893_v24 = vpop.permute.xlu1 %892 }
0x136f   :  { %v895_v46 = vsel %vm74_vm0, %v889_v21, %v893_v24 }
0x1370   :  { %v896_v58 = vpack.c.bf16 %v895_v46, %v895_v46 }
0x1372   :  { %1043 = vmatmul.mubr.msk.bf16.vlgmr.msra.gmra.mrb[24].mxu0 %vm260_vm1, %v896_v58 }
0x1445   :  { %v934_v35 = vpop.f32.mrb[24].mxu0 }
0x1446   :  { %v941_v60 = vadd.f32 %v934_v35, %v1299_v54  ;;  %v936_v59 = vpop.f32.mrb[25].mxu0 }
0x1447   :  { %v942_v61 = vadd.f32 %v936_v59, %v1272_v27  ;;  %v938_v62 = vpop.f32.mrb[26].mxu0 }
0x1448   :  { %1179 = vtanh.f32 %v941_v60  ;;  %v939_v63 = vpop.f32.mrb[27].mxu0  ;;  %v1044_v3 = vmul.f32 -1.442695, %v941_v60 }
0x1449   :  { %1181 = vtanh.f32 %v942_v61  ;;  %v1045_v4 = vmul.f32 -1.442695, %v942_v61 }
0x144a   :  { %1183 = vpow2.f32 %v1044_v3 }
0x144b   :  { %1185 = vpow2.f32 %v1045_v4 }
0x1452   :  { %v1180_v0 = vpop.eup %1179 }
0x1453   :  { %v1182_v2 = vpop.eup %1181  ;;  %952 = vrot.lane.b32.xlu0 %v1180_v0, %s1196_s0 }
0x1454   :  { %976 = vrot.lane.b32.xlu1 %v1182_v2, %s1196_s0  ;;  %v1184_v5 = vpop.eup %1183 }
0x1455   :  { %v1186_v6 = vpop.eup %1185  ;;  %v946_v54 = vadd.f32 1.0, %v1184_v5 }
0x1456   :  { %v970_v11 = vadd.f32 1.0, %v1186_v6 }
0x1457   :  { %1187 = vrcp.f32 %v946_v54 }
0x1458   :  { %1189 = vrcp.f32 %v970_v11 }
0x1461   :  { %v1188_v27 = vpop.eup %1187 }
0x1462   :  { %v1190_v13 = vpop.eup %1189  ;;  %v950_v10 = vmul.f32 %v1188_v27, %v854_v29 }
0x1463   :  { %v974_v42 = vmul.f32 %v1190_v13, %v878_v8 }
0x14c5   :  { %v953_v9 = vpop.permute.xlu0 %952 }
0x14c6   :  { %v955_v14 = vmul.f32 %v1188_v27, %v953_v9  ;;  %v977_v23 = vpop.permute.xlu1 %976 }
0x14c7   :  { %v979_v26 = vmul.f32 %v1190_v13, %v977_v23 }
0x14c8   :  { %957 = vrot.lane.b32.xlu0 %v955_v14, %s1197_s3 }
0x14c9   :  { %981 = vrot.lane.b32.xlu1 %v979_v26, %s1197_s3 }
0x153a   :  { %v958_v12 = vpop.permute.xlu0 %957 }
0x153b   :  { %v960_v22 = vadd.f32 %v958_v12, %v950_v10  ;;  %v982_v39 = vpop.permute.xlu1 %981 }
0x153c   :  { %v984_v25 = vadd.f32 %v982_v39, %v974_v42 }
0x153d   :  { %1191 = vtanh.f32 %v960_v22 }
0x153e   :  { %1193 = vtanh.f32 %v984_v25 }
0x1547   :  { %v1192_v28 = vpop.eup %1191 }
0x1548   :  { %v1194_v30 = vpop.eup %1193  ;;  %963 = vrot.lane.b32.xlu0 %v1192_v28, %s1196_s0 }
0x1549   :  { %987 = vrot.lane.b32.xlu1 %v1194_v30, %s1196_s0 }
0x15ba   :  { %v964_v32 = vpop.permute.xlu0 %963 }
0x15bb   :  { %v966_v34 = vmul.f32 %v1188_v27, %v964_v32  ;;  %v988_v15 = vpop.permute.xlu1 %987 }
0x15bc   :  { %v990_v36 = vmul.f32 %v1190_v13, %v988_v15 }
0x15bd   :  { %v991_v37 = vmax.f32 %v885_v19, %v966_v34 }
0x15be   :  { %v992_v38 = vmax.f32 %v886_v20, %v990_v36 }
0x15bf   :  { %994 = vrot.lane.b32.xlu0 %v991_v37, %s1197_s3 }
0x15c0   :  { %998 = vrot.lane.b32.xlu1 %v992_v38, %s1196_s0 }
0x1631   :  { %v995_v44 = vpop.permute.xlu0 %994 }
0x1632   :  { %v999_v40 = vpop.permute.xlu1 %998 }
0x1633   :  { %v1001_v41 = vsel %vm74_vm0, %v995_v44, %v999_v40 }
0x1634   :  { %1002 = vst.msk [vmem:[%s1560_s4] sm:$0xff] %vm260_vm1, %v1001_v41 }

</bundles_post_ra>
